<compile_context>
chip_gen: v5e
topology: v5e:2x2
jax: 0.10.0
libtpu: 0.0.40
codegen_flags: <defaults>
</compile_context>

<pallas_src>
import functools

import jax
import jax.numpy as jnp
from jax import lax
from jax.experimental import pallas as pl
from jax.experimental.pallas import tpu as pltpu


# ------------------------------ fused kernel ---------------------------------

def _fused_forecast_lstm_kernel(*refs, num_layers, hidden_size, bp, tile_t):
    H = hidden_size
    R = tile_t * bp
    n_w = 3 * num_layers

    x_ref = refs[0]                                  # (T*BP, D) f32, grid-resident
    layer_refs = refs[1:1 + n_w]                     # per layer: W_ih^T(bf16), W_hh^T(bf16), bias(f32)
    fcw_ref = refs[1 + n_w]                          # (1, H)  f32
    fcb_ref = refs[2 + n_w]                          # (1, 1)  f32
    out_ref = refs[3 + n_w]                          # (BP, 1) resident accumulator
    h_sc, c_sc, seq_sc, proj_sc = refs[4 + n_w:]

    tb = pl.program_id(0)

    @pl.when(tb == 0)
    def _init():
        h_sc[...] = jnp.zeros_like(h_sc)
        c_sc[...] = jnp.zeros_like(c_sc)
        out_ref[...] = jnp.zeros_like(out_ref)

    x_row0 = pl.multiple_of(tb * R, 8)
    unroll = tile_t if tile_t <= 8 else 8

    for layer in range(num_layers):
        wih_ref = layer_refs[3 * layer + 0]          # (Din, 4H) bf16
        whh_ref = layer_refs[3 * layer + 1]          # (H, 4H)   bf16
        b_ref = layer_refs[3 * layer + 2]            # (1, 4H)   f32  (b_ih + b_hh)

        # ---- hoisted, time-parallel input projection for the whole tile ----
        # One MXU matmul with M = tile_t*BP rows; bf16 operands, f32 accumulate.
        if layer == 0:
            inp = x_ref[pl.ds(x_row0, R), :].astype(jnp.bfloat16)
        else:
            inp = seq_sc[...].astype(jnp.bfloat16)   # single in-VMEM seq buffer
        proj_sc[...] = (
            jnp.dot(inp, wih_ref[...], preferred_element_type=jnp.float32)
            + b_ref[...])                            # (R, 4H) f32

        w_hh = whh_ref[...]                          # bf16, live across the tile
        write_seq = layer < num_layers - 1           # top layer's seq never consumed

        # TODO(synk): hold W_hh in the MXU weight staging registers for the whole
        # tile (pltpu.matmul_push_rhs / matmul_acc_lhs / matmul_pop) to drop the
        # per-step RHS reload from the serial critical path.

        # ---- serial recurrence over the tile (fori_loop, bounded unroll) ----
        def step(t, carry):
            h, c = carry                             # (BP, H) f32 each
            row = pl.multiple_of(t * bp, 8)
            g = proj_sc[pl.ds(row, bp), :] + jnp.dot(
                h.astype(jnp.bfloat16), w_hh,
                preferred_element_type=jnp.float32)  # (BP, 4H) f32
            # Full-width EUP passes; gates are lane slices of the f32 results.
            sg = jax.nn.sigmoid(g)
            th = jnp.tanh(g)
            i_g = sg[:, 0 * H:1 * H]
            f_g = sg[:, 1 * H:2 * H]
            g_g = th[:, 2 * H:3 * H]
            o_g = sg[:, 3 * H:4 * H]
            c_new = f_g * c + i_g * g_g
            h_new = o_g * jnp.tanh(c_new)
            if write_seq:
                seq_sc[pl.ds(row, bp), :] = h_new    # stays in VMEM, feeds next layer
            return (h_new, c_new)

        h_f, c_f = lax.fori_loop(0, tile_t, step,
                                 (h_sc[layer], c_sc[layer]), unroll=unroll)
        h_sc[layer] = h_f
        c_sc[layer] = c_f

    # ---- fused FC head epilogue: pred = h_top_T @ fc_w^T + fc_b ----
    # VPU multiply + lane reduction (avoids a 1-lane MXU matmul); runs once.
    @pl.when(tb == pl.num_programs(0) - 1)
    def _fc():
        h_last = h_sc[num_layers - 1]                # (BP, H) f32
        out_ref[...] = (jnp.sum(h_last * fcw_ref[...], axis=-1, keepdims=True)
                        + fcb_ref[...])


# ------------------------------- wrapper --------------------------------------

def _pick_tile_t(T, max_tile_t):
    """Largest divisor of T that is <= max_tile_t. Rows are always 8-sublane
    aligned (batch padded to BP), so any divisor is legal; worst case tile_t=1."""
    for cand in range(min(T, max_tile_t), 0, -1):
        if T % cand == 0:
            return cand
    return 1


def forecast_lstm_forward(x_btd, lstm_params, fc_w_row, fc_b, *, max_tile_t=32):
    """x_btd: (B, T, input_size), batch_first like nn.LSTM(batch_first=True).
       Returns pred: (B, 1) == fc(h[-1])."""
    x = jnp.transpose(x_btd.astype(jnp.float32), (1, 0, 2))          # (T, B, D)
    T, B, D = x.shape
    H = lstm_params[0][1].shape[0]
    L = len(lstm_params)

    BP = max(8, ((B + 7) // 8) * 8)    # batch rows padded to full sublanes
    tile_t = _pick_tile_t(T, max_tile_t)
    num_tiles = T // tile_t
    R = tile_t * BP

    # Time-major rows, batch padded with zero rows: every per-step block is a full
    # (8, .) sublane tile (aligned loads/stores, M=BP for the recurrence matmul).
    x_pad = jnp.zeros((T, BP, D), jnp.float32).at[:, :B, :].set(x)
    x_flat = x_pad.reshape(T * BP, D)                                # row = t*BP + b

    # x is tiny (D small): keep the whole padded sequence grid-resident and slice
    # the current tile inside the kernel — no per-tile lane-sparse x DMA.
    in_specs = [pl.BlockSpec((T * BP, D), lambda i: (0, 0))]
    inputs = [x_flat]
    for (w_ih_t, w_hh_t, bias) in lstm_params:
        din = w_ih_t.shape[0]
        # Grid-resident weights, bf16 operands for the MXU (f32 accumulate in-kernel).
        # TODO(synk): for large H (esp. v7x's 64 MiB VMEM) add
        # pipeline_mode=pl.Buffered(1) to these constant-index-map specs and set
        # CompilerParams(vmem_limit_bytes=...) per chip generation.
        in_specs += [
            pl.BlockSpec((din, 4 * H), lambda i: (0, 0)),
            pl.BlockSpec((H, 4 * H), lambda i: (0, 0)),
            pl.BlockSpec((1, 4 * H), lambda i: (0, 0)),
        ]
        inputs += [w_ih_t.astype(jnp.bfloat16), w_hh_t.astype(jnp.bfloat16),
                   bias.astype(jnp.float32)]
    in_specs += [pl.BlockSpec((1, H), lambda i: (0, 0)),
                 pl.BlockSpec((1, 1), lambda i: (0, 0))]
    inputs += [fc_w_row.astype(jnp.float32), fc_b.astype(jnp.float32)]

    kernel = functools.partial(
        _fused_forecast_lstm_kernel,
        num_layers=L, hidden_size=H, bp=BP, tile_t=tile_t)

    # TODO(synk): on v7x, give the second TensorCore work (a leading "parallel"
    # grid axis over >=8-row batch tiles) once the real inference batch allows it.
    out = pl.pallas_call(
        kernel,
        out_shape=jax.ShapeDtypeStruct((BP, 1), jnp.float32),
        grid_spec=pltpu.PrefetchScalarGridSpec(
            num_scalar_prefetch=0,
            grid=(num_tiles,),
            in_specs=in_specs,
            out_specs=pl.BlockSpec((BP, 1), lambda i: (0, 0)),
            scratch_shapes=[
                pltpu.VMEM((L, BP, H), jnp.float32),       # h state, all layers
                pltpu.VMEM((L, BP, H), jnp.float32),       # c state, all layers
                pltpu.VMEM((R, H), jnp.float32),           # inter-layer seq (single)
                pltpu.VMEM((R, 4 * H), jnp.float32),       # hoisted gate pre-activations
            ]),
        compiler_params=pltpu.CompilerParams(
            dimension_semantics=("arbitrary",)),           # time recurrence is serial
    )(*inputs)
    return out[:B]


# ---------------------------- parameter setup ---------------------------------

def init_params(key, input_size, hidden_size, num_layers):
    """Mirrors forecastLSTM.init_weights():
       - weight_ih: kaiming_normal_ (std = sqrt(2/fan_in))
       - weight_hh: orthogonal_
       - LSTM biases: 0 (b_ih + b_hh passed pre-summed as one row)
       - fc.weight: kaiming_uniform_ then constant_(0)  => zeros
       - fc.bias:   PyTorch Linear default uniform(-1/sqrt(H), 1/sqrt(H)) (not reset)
    """
    lstm_params = []
    ortho = jax.nn.initializers.orthogonal()
    for layer in range(num_layers):
        in_dim = input_size if layer == 0 else hidden_size
        key, k1, k2 = jax.random.split(key, 3)
        w_ih = (jax.random.normal(k1, (4 * hidden_size, in_dim), jnp.float32)
                * jnp.sqrt(2.0 / in_dim))
        w_hh = ortho(k2, (4 * hidden_size, hidden_size), jnp.float32)
        bias = jnp.zeros((1, 4 * hidden_size), jnp.float32)
        lstm_params.append((jnp.asarray(w_ih).T, jnp.asarray(w_hh).T, bias))

    key, kb = jax.random.split(key)
    fc_w_row = jnp.zeros((1, hidden_size), jnp.float32)
    bound = 1.0 / (hidden_size ** 0.5)
    fc_b = jax.random.uniform(kb, (1, 1), jnp.float32, -bound, bound)
    return lstm_params, fc_w_row, fc_b


# ---------------------------- pure-JAX reference -------------------------------

def reference_forward(x_btd, lstm_params, fc_w_row, fc_b, *, mxu_bf16=False):
    """mxu_bf16=False: f32 HIGHEST-precision ground truth.
       mxu_bf16=True : emulates the kernel's MXU numerics (bf16 operands, f32 acc)."""
    x = jnp.transpose(x_btd.astype(jnp.float32), (1, 0, 2))          # (T, B, D)
    T, B, _ = x.shape
    hp = jax.lax.Precision.HIGHEST

    def mm(a, w):
        if mxu_bf16:
            return jnp.dot(a.astype(jnp.bfloat16), w.astype(jnp.bfloat16),
                           preferred_element_type=jnp.float32)
        return jnp.dot(a, w, precision=hp)

    h = None
    for (w_ih_t, w_hh_t, bias) in lstm_params:
        H = w_hh_t.shape[0]
        h = jnp.zeros((B, H), jnp.float32)
        c = jnp.zeros((B, H), jnp.float32)
        outs = []
        for t in range(T):
            g = mm(x[t], w_ih_t) + mm(h, w_hh_t) + bias
            i_g = jax.nn.sigmoid(g[:, 0 * H:1 * H])
            f_g = jax.nn.sigmoid(g[:, 1 * H:2 * H])
            g_g = jnp.tanh(g[:, 2 * H:3 * H])
            o_g = jax.nn.sigmoid(g[:, 3 * H:4 * H])
            c = f_g * c + i_g * g_g
            h = o_g * jnp.tanh(c)
            outs.append(h)
        x = jnp.stack(outs, axis=0)
    return jnp.sum(h * fc_w_row, axis=-1, keepdims=True) + fc_b


# ---------------------------------- main ---------------------------------------

if __name__ == "__main__":
    INPUT_SIZE = 4
    HIDDEN_SIZE = 32
    NUM_LAYERS = 2
    BATCH = 2
    SEQ = 8

    key = jax.random.PRNGKey(0)
    key, kx = jax.random.split(key)
    x = jax.random.normal(kx, (BATCH, SEQ, INPUT_SIZE), jnp.float32)

    lstm_params, fc_w_row, fc_b = init_params(key, INPUT_SIZE, HIDDEN_SIZE, NUM_LAYERS)

    # 1) Faithful-to-init forward (fc.weight is zero at init exactly as PyTorch's
    #    init_weights() leaves it, so pred == fc.bias by construction).
    pred = jax.block_until_ready(forecast_lstm_forward(x, lstm_params, fc_w_row, fc_b))
    assert pred.shape == (BATCH, 1), pred.shape

    # 2) Numerical check (multi-tile path, grid=(2,), fully-unrolled recurrence)
    #    with a non-zero fc weight so the LSTM path is exercised.
    key, kw = jax.random.split(key)
    fc_w_chk = jax.random.normal(kw, (1, HIDDEN_SIZE), jnp.float32) * 0.1
    got = forecast_lstm_forward(x, lstm_params, fc_w_chk, fc_b, max_tile_t=4)
    want_bf16 = reference_forward(x, lstm_params, fc_w_chk, fc_b, mxu_bf16=True)
    want_f32 = reference_forward(x, lstm_params, fc_w_chk, fc_b)
    got, want_bf16, want_f32 = jax.block_until_ready((got, want_bf16, want_f32))
    # Strict vs. a reference that emulates the kernel's bf16-operand MXU numerics.
    assert bool(jnp.allclose(got, want_bf16, rtol=1e-2, atol=1e-2)), (got, want_bf16)
    # Loose vs. the f32 HIGHEST-precision ground truth (bf16 operand drift).
    assert bool(jnp.allclose(got, want_f32, rtol=5e-2, atol=5e-2)), (got, want_f32)

    # 3) Longer sequence: exercises the partially-unrolled fori_loop path
    #    (tile_t=16 > 8) across two time tiles.
    key, kx2 = jax.random.split(key)
    SEQ2 = 32
    x2 = jax.random.normal(kx2, (BATCH, SEQ2, INPUT_SIZE), jnp.float32)
    got2 = forecast_lstm_forward(x2, lstm_params, fc_w_chk, fc_b, max_tile_t=16)
    want2 = reference_forward(x2, lstm_params, fc_w_chk, fc_b, mxu_bf16=True)
    got2, want2 = jax.block_until_ready((got2, want2))
    assert bool(jnp.allclose(got2, want2, rtol=1e-2, atol=1e-2)), (got2, want2)

    print("KERNEL_OK")
</pallas_src>

<mosaic_0001>
module attributes {stable_mosaic.version = 11 : i64} {
  func.func @_fused_forecast_lstm_kernel(%arg0: i32, %arg1: memref<64x4xf32, #tpu.memory_space<vmem>>, %arg2: memref<4x128xbf16, #tpu.memory_space<vmem>>, %arg3: memref<32x128xbf16, #tpu.memory_space<vmem>>, %arg4: memref<1x128xf32, #tpu.memory_space<vmem>>, %arg5: memref<32x128xbf16, #tpu.memory_space<vmem>>, %arg6: memref<32x128xbf16, #tpu.memory_space<vmem>>, %arg7: memref<1x128xf32, #tpu.memory_space<vmem>>, %arg8: memref<1x32xf32, #tpu.memory_space<vmem>>, %arg9: memref<1x1xf32, #tpu.memory_space<vmem>>, %arg10: memref<8x1xf32, #tpu.memory_space<vmem>>, %arg11: memref<2x8x32xf32, #tpu.memory_space<vmem>>, %arg12: memref<2x8x32xf32, #tpu.memory_space<vmem>>, %arg13: memref<64x32xf32, #tpu.memory_space<vmem>>, %arg14: memref<64x128xf32, #tpu.memory_space<vmem>>) attributes {dimension_semantics = [#tpu.dimension_semantics<arbitrary>], iteration_bounds = array<i64: 1>, scalar_prefetch = 0 : i64, scratch_operands = 4 : i64, tpu.core_type = #tpu.core_type<tc>, window_params = [{pipeline_mode = #tpu.pipeline_mode<synchronous>, transform_indices = @transform_0, window_bounds = array<i64: 64, 4>}, {pipeline_mode = #tpu.pipeline_mode<synchronous>, transform_indices = @transform_1, window_bounds = array<i64: 4, 128>}, {pipeline_mode = #tpu.pipeline_mode<synchronous>, transform_indices = @transform_2, window_bounds = array<i64: 32, 128>}, {pipeline_mode = #tpu.pipeline_mode<synchronous>, transform_indices = @transform_3, window_bounds = array<i64: 1, 128>}, {pipeline_mode = #tpu.pipeline_mode<synchronous>, transform_indices = @transform_4, window_bounds = array<i64: 32, 128>}, {pipeline_mode = #tpu.pipeline_mode<synchronous>, transform_indices = @transform_5, window_bounds = array<i64: 32, 128>}, {pipeline_mode = #tpu.pipeline_mode<synchronous>, transform_indices = @transform_6, window_bounds = array<i64: 1, 128>}, {pipeline_mode = #tpu.pipeline_mode<synchronous>, transform_indices = @transform_7, window_bounds = array<i64: 1, 32>}, {pipeline_mode = #tpu.pipeline_mode<synchronous>, transform_indices = @transform_8, window_bounds = array<i64: 1, 1>}, {pipeline_mode = #tpu.pipeline_mode<synchronous>, transform_indices = @transform_9, window_bounds = array<i64: 8, 1>}]} {
    %c0_i32 = arith.constant 0 : i32
    %0 = arith.cmpi eq, %arg0, %c0_i32 : i32
    %1 = arith.extui %0 : i1 to i32
    %c0_i32_0 = arith.constant 0 : i32
    %2 = arith.cmpi ne, %1, %c0_i32_0 : i32
    scf.if %2 {
      %cst_127 = arith.constant 0.000000e+00 : f32
      %415 = vector.broadcast %cst_127 : f32 to vector<2x8x32xf32>
      %c0_128 = arith.constant 0 : index
      %c0_129 = arith.constant 0 : index
      %c0_130 = arith.constant 0 : index
      %416 = vector.load %arg11[%c0_128, %c0_129, %c0_130] : memref<2x8x32xf32, #tpu.memory_space<vmem>>, vector<2x8x32xf32>
      tpu.vector_store %arg11[%c0_128, %c0_129, %c0_130], %415 {strides = array<i32>} : memref<2x8x32xf32, #tpu.memory_space<vmem>>, vector<2x8x32xf32>,
      %cst_131 = arith.constant 0.000000e+00 : f32
      %417 = vector.broadcast %cst_131 : f32 to vector<2x8x32xf32>
      %c0_132 = arith.constant 0 : index
      %c0_133 = arith.constant 0 : index
      %c0_134 = arith.constant 0 : index
      %418 = vector.load %arg12[%c0_132, %c0_133, %c0_134] : memref<2x8x32xf32, #tpu.memory_space<vmem>>, vector<2x8x32xf32>
      tpu.vector_store %arg12[%c0_132, %c0_133, %c0_134], %417 {strides = array<i32>} : memref<2x8x32xf32, #tpu.memory_space<vmem>>, vector<2x8x32xf32>,
      %cst_135 = arith.constant 0.000000e+00 : f32
      %419 = vector.broadcast %cst_135 : f32 to vector<8x1xf32>
      %c0_136 = arith.constant 0 : index
      %c0_137 = arith.constant 0 : index
      %420 = vector.load %arg10[%c0_136, %c0_137] : memref<8x1xf32, #tpu.memory_space<vmem>>, vector<8x1xf32>
      tpu.vector_store %arg10[%c0_136, %c0_137], %419 {strides = array<i32>} : memref<8x1xf32, #tpu.memory_space<vmem>>, vector<8x1xf32>,
    } else {
    }
    %c64_i32 = arith.constant 64 : i32
    %3 = arith.muli %arg0, %c64_i32 : i32
    %4 = tpu.assume_multiple %3, 8 : i32
    %5 = arith.index_cast %4 : i32 to index
    %c0 = arith.constant 0 : index
    %6 = vector.load %arg1[%5, %c0] : memref<64x4xf32, #tpu.memory_space<vmem>>, vector<64x4xf32>
    %7 = arith.truncf %6 : vector<64x4xf32> to vector<64x4xbf16>
    %c0_1 = arith.constant 0 : index
    %c0_2 = arith.constant 0 : index
    %8 = vector.load %arg2[%c0_1, %c0_2] : memref<4x128xbf16, #tpu.memory_space<vmem>>, vector<4x128xbf16>
    %cst = arith.constant dense<0.000000e+00> : vector<64x128xf32>
    %9 = tpu.matmul %7, %8, %cst {dimension_numbers = #tpu.dot_dimension_numbers<[1], [0], [0], [1], [0, 0, 1, 1], [], []>} : vector<64x4xbf16>, vector<4x128xbf16>, vector<64x128xf32> -> vector<64x128xf32>
    %c0_3 = arith.constant 0 : index
    %c0_4 = arith.constant 0 : index
    %10 = vector.load %arg4[%c0_3, %c0_4] : memref<1x128xf32, #tpu.memory_space<vmem>>, vector<1x128xf32>
    %11 = vector.broadcast %10 : vector<1x128xf32> to vector<64x128xf32>
    %12 = arith.addf %9, %11 : vector<64x128xf32>
    %c0_5 = arith.constant 0 : index
    %c0_6 = arith.constant 0 : index
    %13 = vector.load %arg14[%c0_5, %c0_6] : memref<64x128xf32, #tpu.memory_space<vmem>>, vector<64x128xf32>
    tpu.vector_store %arg14[%c0_5, %c0_6], %12 {strides = array<i32>} : memref<64x128xf32, #tpu.memory_space<vmem>>, vector<64x128xf32>,
    %c0_7 = arith.constant 0 : index
    %c0_8 = arith.constant 0 : index
    %14 = vector.load %arg3[%c0_7, %c0_8] : memref<32x128xbf16, #tpu.memory_space<vmem>>, vector<32x128xbf16>
    %c0_9 = arith.constant 0 : index
    %c0_10 = arith.constant 0 : index
    %c0_11 = arith.constant 0 : index
    %15 = vector.load %arg11[%c0_9, %c0_10, %c0_11] : memref<2x8x32xf32, #tpu.memory_space<vmem>>, vector<1x8x32xf32>
    %16 = vector.shape_cast %15 : vector<1x8x32xf32> to vector<8x32xf32>
    %c0_12 = arith.constant 0 : index
    %c0_13 = arith.constant 0 : index
    %c0_14 = arith.constant 0 : index
    %17 = vector.load %arg12[%c0_12, %c0_13, %c0_14] : memref<2x8x32xf32, #tpu.memory_space<vmem>>, vector<1x8x32xf32>
    %18 = vector.shape_cast %17 : vector<1x8x32xf32> to vector<8x32xf32>
    %c0_i32_15 = arith.constant 0 : i32
    %c8_i32 = arith.constant 8 : i32
    %19 = arith.muli %c0_i32_15, %c8_i32 : i32
    %20 = tpu.assume_multiple %19, 8 : i32
    %21 = arith.index_cast %20 : i32 to index
    %c0_16 = arith.constant 0 : index
    %22 = vector.load %arg14[%21, %c0_16] : memref<64x128xf32, #tpu.memory_space<vmem>>, vector<8x128xf32>
    %23 = arith.truncf %16 : vector<8x32xf32> to vector<8x32xbf16>
    %cst_17 = arith.constant dense<0.000000e+00> : vector<8x128xf32>
    %24 = tpu.matmul %23, %14, %cst_17 {dimension_numbers = #tpu.dot_dimension_numbers<[1], [0], [0], [1], [0, 0, 1, 1], [], []>} : vector<8x32xbf16>, vector<32x128xbf16>, vector<8x128xf32> -> vector<8x128xf32>
    %25 = arith.addf %22, %24 : vector<8x128xf32>
    %26 = arith.negf %25 : vector<8x128xf32>
    %27 = math.exp %26 : vector<8x128xf32>
    %cst_18 = arith.constant 1.000000e+00 : f32
    %28 = vector.broadcast %cst_18 : f32 to vector<8x128xf32>
    %29 = arith.addf %28, %27 : vector<8x128xf32>
    %30 = arith.divf %28, %29 : vector<8x128xf32>
    %31 = math.tanh %25 : vector<8x128xf32>
    %32 = vector.extract_strided_slice %30 {offsets = [0, 0], sizes = [8, 32], strides = [1, 1]} : vector<8x128xf32> to vector<8x32xf32>
    %33 = vector.extract_strided_slice %30 {offsets = [0, 32], sizes = [8, 32], strides = [1, 1]} : vector<8x128xf32> to vector<8x32xf32>
    %34 = vector.extract_strided_slice %31 {offsets = [0, 64], sizes = [8, 32], strides = [1, 1]} : vector<8x128xf32> to vector<8x32xf32>
    %35 = vector.extract_strided_slice %30 {offsets = [0, 96], sizes = [8, 32], strides = [1, 1]} : vector<8x128xf32> to vector<8x32xf32>
    %36 = arith.mulf %33, %18 : vector<8x32xf32>
    %37 = arith.mulf %32, %34 : vector<8x32xf32>
    %38 = arith.addf %36, %37 : vector<8x32xf32>
    %39 = math.tanh %38 : vector<8x32xf32>
    %40 = arith.mulf %35, %39 : vector<8x32xf32>
    %41 = arith.index_cast %20 : i32 to index
    %c0_19 = arith.constant 0 : index
    %42 = vector.load %arg13[%41, %c0_19] : memref<64x32xf32, #tpu.memory_space<vmem>>, vector<8x32xf32>
    tpu.vector_store %arg13[%41, %c0_19], %40 {strides = array<i32>} : memref<64x32xf32, #tpu.memory_space<vmem>>, vector<8x32xf32>,
    %c1_i32 = arith.constant 1 : i32
    %c8_i32_20 = arith.constant 8 : i32
    %43 = arith.muli %c1_i32, %c8_i32_20 : i32
    %44 = tpu.assume_multiple %43, 8 : i32
    %45 = arith.index_cast %44 : i32 to index
    %c0_21 = arith.constant 0 : index
    %46 = vector.load %arg14[%45, %c0_21] : memref<64x128xf32, #tpu.memory_space<vmem>>, vector<8x128xf32>
    %47 = arith.truncf %40 : vector<8x32xf32> to vector<8x32xbf16>
    %cst_22 = arith.constant dense<0.000000e+00> : vector<8x128xf32>
    %48 = tpu.matmul %47, %14, %cst_22 {dimension_numbers = #tpu.dot_dimension_numbers<[1], [0], [0], [1], [0, 0, 1, 1], [], []>} : vector<8x32xbf16>, vector<32x128xbf16>, vector<8x128xf32> -> vector<8x128xf32>
    %49 = arith.addf %46, %48 : vector<8x128xf32>
    %50 = arith.negf %49 : vector<8x128xf32>
    %51 = math.exp %50 : vector<8x128xf32>
    %cst_23 = arith.constant 1.000000e+00 : f32
    %52 = vector.broadcast %cst_23 : f32 to vector<8x128xf32>
    %53 = arith.addf %52, %51 : vector<8x128xf32>
    %54 = arith.divf %52, %53 : vector<8x128xf32>
    %55 = math.tanh %49 : vector<8x128xf32>
    %56 = vector.extract_strided_slice %54 {offsets = [0, 0], sizes = [8, 32], strides = [1, 1]} : vector<8x128xf32> to vector<8x32xf32>
    %57 = vector.extract_strided_slice %54 {offsets = [0, 32], sizes = [8, 32], strides = [1, 1]} : vector<8x128xf32> to vector<8x32xf32>
    %58 = vector.extract_strided_slice %55 {offsets = [0, 64], sizes = [8, 32], strides = [1, 1]} : vector<8x128xf32> to vector<8x32xf32>
    %59 = vector.extract_strided_slice %54 {offsets = [0, 96], sizes = [8, 32], strides = [1, 1]} : vector<8x128xf32> to vector<8x32xf32>
    %60 = arith.mulf %57, %38 : vector<8x32xf32>
    %61 = arith.mulf %56, %58 : vector<8x32xf32>
    %62 = arith.addf %60, %61 : vector<8x32xf32>
    %63 = math.tanh %62 : vector<8x32xf32>
    %64 = arith.mulf %59, %63 : vector<8x32xf32>
    %65 = arith.index_cast %44 : i32 to index
    %c0_24 = arith.constant 0 : index
    %66 = vector.load %arg13[%65, %c0_24] : memref<64x32xf32, #tpu.memory_space<vmem>>, vector<8x32xf32>
    tpu.vector_store %arg13[%65, %c0_24], %64 {strides = array<i32>} : memref<64x32xf32, #tpu.memory_space<vmem>>, vector<8x32xf32>,
    %c2_i32 = arith.constant 2 : i32
    %c8_i32_25 = arith.constant 8 : i32
    %67 = arith.muli %c2_i32, %c8_i32_25 : i32
    %68 = tpu.assume_multiple %67, 8 : i32
    %69 = arith.index_cast %68 : i32 to index
    %c0_26 = arith.constant 0 : index
    %70 = vector.load %arg14[%69, %c0_26] : memref<64x128xf32, #tpu.memory_space<vmem>>, vector<8x128xf32>
    %71 = arith.truncf %64 : vector<8x32xf32> to vector<8x32xbf16>
    %cst_27 = arith.constant dense<0.000000e+00> : vector<8x128xf32>
    %72 = tpu.matmul %71, %14, %cst_27 {dimension_numbers = #tpu.dot_dimension_numbers<[1], [0], [0], [1], [0, 0, 1, 1], [], []>} : vector<8x32xbf16>, vector<32x128xbf16>, vector<8x128xf32> -> vector<8x128xf32>
    %73 = arith.addf %70, %72 : vector<8x128xf32>
    %74 = arith.negf %73 : vector<8x128xf32>
    %75 = math.exp %74 : vector<8x128xf32>
    %cst_28 = arith.constant 1.000000e+00 : f32
    %76 = vector.broadcast %cst_28 : f32 to vector<8x128xf32>
    %77 = arith.addf %76, %75 : vector<8x128xf32>
    %78 = arith.divf %76, %77 : vector<8x128xf32>
    %79 = math.tanh %73 : vector<8x128xf32>
    %80 = vector.extract_strided_slice %78 {offsets = [0, 0], sizes = [8, 32], strides = [1, 1]} : vector<8x128xf32> to vector<8x32xf32>
    %81 = vector.extract_strided_slice %78 {offsets = [0, 32], sizes = [8, 32], strides = [1, 1]} : vector<8x128xf32> to vector<8x32xf32>
    %82 = vector.extract_strided_slice %79 {offsets = [0, 64], sizes = [8, 32], strides = [1, 1]} : vector<8x128xf32> to vector<8x32xf32>
    %83 = vector.extract_strided_slice %78 {offsets = [0, 96], sizes = [8, 32], strides = [1, 1]} : vector<8x128xf32> to vector<8x32xf32>
    %84 = arith.mulf %81, %62 : vector<8x32xf32>
    %85 = arith.mulf %80, %82 : vector<8x32xf32>
    %86 = arith.addf %84, %85 : vector<8x32xf32>
    %87 = math.tanh %86 : vector<8x32xf32>
    %88 = arith.mulf %83, %87 : vector<8x32xf32>
    %89 = arith.index_cast %68 : i32 to index
    %c0_29 = arith.constant 0 : index
    %90 = vector.load %arg13[%89, %c0_29] : memref<64x32xf32, #tpu.memory_space<vmem>>, vector<8x32xf32>
    tpu.vector_store %arg13[%89, %c0_29], %88 {strides = array<i32>} : memref<64x32xf32, #tpu.memory_space<vmem>>, vector<8x32xf32>,
    %c3_i32 = arith.constant 3 : i32
    %c8_i32_30 = arith.constant 8 : i32
    %91 = arith.muli %c3_i32, %c8_i32_30 : i32
    %92 = tpu.assume_multiple %91, 8 : i32
    %93 = arith.index_cast %92 : i32 to index
    %c0_31 = arith.constant 0 : index
    %94 = vector.load %arg14[%93, %c0_31] : memref<64x128xf32, #tpu.memory_space<vmem>>, vector<8x128xf32>
    %95 = arith.truncf %88 : vector<8x32xf32> to vector<8x32xbf16>
    %cst_32 = arith.constant dense<0.000000e+00> : vector<8x128xf32>
    %96 = tpu.matmul %95, %14, %cst_32 {dimension_numbers = #tpu.dot_dimension_numbers<[1], [0], [0], [1], [0, 0, 1, 1], [], []>} : vector<8x32xbf16>, vector<32x128xbf16>, vector<8x128xf32> -> vector<8x128xf32>
    %97 = arith.addf %94, %96 : vector<8x128xf32>
    %98 = arith.negf %97 : vector<8x128xf32>
    %99 = math.exp %98 : vector<8x128xf32>
    %cst_33 = arith.constant 1.000000e+00 : f32
    %100 = vector.broadcast %cst_33 : f32 to vector<8x128xf32>
    %101 = arith.addf %100, %99 : vector<8x128xf32>
    %102 = arith.divf %100, %101 : vector<8x128xf32>
    %103 = math.tanh %97 : vector<8x128xf32>
    %104 = vector.extract_strided_slice %102 {offsets = [0, 0], sizes = [8, 32], strides = [1, 1]} : vector<8x128xf32> to vector<8x32xf32>
    %105 = vector.extract_strided_slice %102 {offsets = [0, 32], sizes = [8, 32], strides = [1, 1]} : vector<8x128xf32> to vector<8x32xf32>
    %106 = vector.extract_strided_slice %103 {offsets = [0, 64], sizes = [8, 32], strides = [1, 1]} : vector<8x128xf32> to vector<8x32xf32>
    %107 = vector.extract_strided_slice %102 {offsets = [0, 96], sizes = [8, 32], strides = [1, 1]} : vector<8x128xf32> to vector<8x32xf32>
    %108 = arith.mulf %105, %86 : vector<8x32xf32>
    %109 = arith.mulf %104, %106 : vector<8x32xf32>
    %110 = arith.addf %108, %109 : vector<8x32xf32>
    %111 = math.tanh %110 : vector<8x32xf32>
    %112 = arith.mulf %107, %111 : vector<8x32xf32>
    %113 = arith.index_cast %92 : i32 to index
    %c0_34 = arith.constant 0 : index
    %114 = vector.load %arg13[%113, %c0_34] : memref<64x32xf32, #tpu.memory_space<vmem>>, vector<8x32xf32>
    tpu.vector_store %arg13[%113, %c0_34], %112 {strides = array<i32>} : memref<64x32xf32, #tpu.memory_space<vmem>>, vector<8x32xf32>,
    %c4_i32 = arith.constant 4 : i32
    %c8_i32_35 = arith.constant 8 : i32
    %115 = arith.muli %c4_i32, %c8_i32_35 : i32
    %116 = tpu.assume_multiple %115, 8 : i32
    %117 = arith.index_cast %116 : i32 to index
    %c0_36 = arith.constant 0 : index
    %118 = vector.load %arg14[%117, %c0_36] : memref<64x128xf32, #tpu.memory_space<vmem>>, vector<8x128xf32>
    %119 = arith.truncf %112 : vector<8x32xf32> to vector<8x32xbf16>
    %cst_37 = arith.constant dense<0.000000e+00> : vector<8x128xf32>
    %120 = tpu.matmul %119, %14, %cst_37 {dimension_numbers = #tpu.dot_dimension_numbers<[1], [0], [0], [1], [0, 0, 1, 1], [], []>} : vector<8x32xbf16>, vector<32x128xbf16>, vector<8x128xf32> -> vector<8x128xf32>
    %121 = arith.addf %118, %120 : vector<8x128xf32>
    %122 = arith.negf %121 : vector<8x128xf32>
    %123 = math.exp %122 : vector<8x128xf32>
    %cst_38 = arith.constant 1.000000e+00 : f32
    %124 = vector.broadcast %cst_38 : f32 to vector<8x128xf32>
    %125 = arith.addf %124, %123 : vector<8x128xf32>
    %126 = arith.divf %124, %125 : vector<8x128xf32>
    %127 = math.tanh %121 : vector<8x128xf32>
    %128 = vector.extract_strided_slice %126 {offsets = [0, 0], sizes = [8, 32], strides = [1, 1]} : vector<8x128xf32> to vector<8x32xf32>
    %129 = vector.extract_strided_slice %126 {offsets = [0, 32], sizes = [8, 32], strides = [1, 1]} : vector<8x128xf32> to vector<8x32xf32>
    %130 = vector.extract_strided_slice %127 {offsets = [0, 64], sizes = [8, 32], strides = [1, 1]} : vector<8x128xf32> to vector<8x32xf32>
    %131 = vector.extract_strided_slice %126 {offsets = [0, 96], sizes = [8, 32], strides = [1, 1]} : vector<8x128xf32> to vector<8x32xf32>
    %132 = arith.mulf %129, %110 : vector<8x32xf32>
    %133 = arith.mulf %128, %130 : vector<8x32xf32>
    %134 = arith.addf %132, %133 : vector<8x32xf32>
    %135 = math.tanh %134 : vector<8x32xf32>
    %136 = arith.mulf %131, %135 : vector<8x32xf32>
    %137 = arith.index_cast %116 : i32 to index
    %c0_39 = arith.constant 0 : index
    %138 = vector.load %arg13[%137, %c0_39] : memref<64x32xf32, #tpu.memory_space<vmem>>, vector<8x32xf32>
    tpu.vector_store %arg13[%137, %c0_39], %136 {strides = array<i32>} : memref<64x32xf32, #tpu.memory_space<vmem>>, vector<8x32xf32>,
    %c5_i32 = arith.constant 5 : i32
    %c8_i32_40 = arith.constant 8 : i32
    %139 = arith.muli %c5_i32, %c8_i32_40 : i32
    %140 = tpu.assume_multiple %139, 8 : i32
    %141 = arith.index_cast %140 : i32 to index
    %c0_41 = arith.constant 0 : index
    %142 = vector.load %arg14[%141, %c0_41] : memref<64x128xf32, #tpu.memory_space<vmem>>, vector<8x128xf32>
    %143 = arith.truncf %136 : vector<8x32xf32> to vector<8x32xbf16>
    %cst_42 = arith.constant dense<0.000000e+00> : vector<8x128xf32>
    %144 = tpu.matmul %143, %14, %cst_42 {dimension_numbers = #tpu.dot_dimension_numbers<[1], [0], [0], [1], [0, 0, 1, 1], [], []>} : vector<8x32xbf16>, vector<32x128xbf16>, vector<8x128xf32> -> vector<8x128xf32>
    %145 = arith.addf %142, %144 : vector<8x128xf32>
    %146 = arith.negf %145 : vector<8x128xf32>
    %147 = math.exp %146 : vector<8x128xf32>
    %cst_43 = arith.constant 1.000000e+00 : f32
    %148 = vector.broadcast %cst_43 : f32 to vector<8x128xf32>
    %149 = arith.addf %148, %147 : vector<8x128xf32>
    %150 = arith.divf %148, %149 : vector<8x128xf32>
    %151 = math.tanh %145 : vector<8x128xf32>
    %152 = vector.extract_strided_slice %150 {offsets = [0, 0], sizes = [8, 32], strides = [1, 1]} : vector<8x128xf32> to vector<8x32xf32>
    %153 = vector.extract_strided_slice %150 {offsets = [0, 32], sizes = [8, 32], strides = [1, 1]} : vector<8x128xf32> to vector<8x32xf32>
    %154 = vector.extract_strided_slice %151 {offsets = [0, 64], sizes = [8, 32], strides = [1, 1]} : vector<8x128xf32> to vector<8x32xf32>
    %155 = vector.extract_strided_slice %150 {offsets = [0, 96], sizes = [8, 32], strides = [1, 1]} : vector<8x128xf32> to vector<8x32xf32>
    %156 = arith.mulf %153, %134 : vector<8x32xf32>
    %157 = arith.mulf %152, %154 : vector<8x32xf32>
    %158 = arith.addf %156, %157 : vector<8x32xf32>
    %159 = math.tanh %158 : vector<8x32xf32>
    %160 = arith.mulf %155, %159 : vector<8x32xf32>
    %161 = arith.index_cast %140 : i32 to index
    %c0_44 = arith.constant 0 : index
    %162 = vector.load %arg13[%161, %c0_44] : memref<64x32xf32, #tpu.memory_space<vmem>>, vector<8x32xf32>
    tpu.vector_store %arg13[%161, %c0_44], %160 {strides = array<i32>} : memref<64x32xf32, #tpu.memory_space<vmem>>, vector<8x32xf32>,
    %c6_i32 = arith.constant 6 : i32
    %c8_i32_45 = arith.constant 8 : i32
    %163 = arith.muli %c6_i32, %c8_i32_45 : i32
    %164 = tpu.assume_multiple %163, 8 : i32
    %165 = arith.index_cast %164 : i32 to index
    %c0_46 = arith.constant 0 : index
    %166 = vector.load %arg14[%165, %c0_46] : memref<64x128xf32, #tpu.memory_space<vmem>>, vector<8x128xf32>
    %167 = arith.truncf %160 : vector<8x32xf32> to vector<8x32xbf16>
    %cst_47 = arith.constant dense<0.000000e+00> : vector<8x128xf32>
    %168 = tpu.matmul %167, %14, %cst_47 {dimension_numbers = #tpu.dot_dimension_numbers<[1], [0], [0], [1], [0, 0, 1, 1], [], []>} : vector<8x32xbf16>, vector<32x128xbf16>, vector<8x128xf32> -> vector<8x128xf32>
    %169 = arith.addf %166, %168 : vector<8x128xf32>
    %170 = arith.negf %169 : vector<8x128xf32>
    %171 = math.exp %170 : vector<8x128xf32>
    %cst_48 = arith.constant 1.000000e+00 : f32
    %172 = vector.broadcast %cst_48 : f32 to vector<8x128xf32>
    %173 = arith.addf %172, %171 : vector<8x128xf32>
    %174 = arith.divf %172, %173 : vector<8x128xf32>
    %175 = math.tanh %169 : vector<8x128xf32>
    %176 = vector.extract_strided_slice %174 {offsets = [0, 0], sizes = [8, 32], strides = [1, 1]} : vector<8x128xf32> to vector<8x32xf32>
    %177 = vector.extract_strided_slice %174 {offsets = [0, 32], sizes = [8, 32], strides = [1, 1]} : vector<8x128xf32> to vector<8x32xf32>
    %178 = vector.extract_strided_slice %175 {offsets = [0, 64], sizes = [8, 32], strides = [1, 1]} : vector<8x128xf32> to vector<8x32xf32>
    %179 = vector.extract_strided_slice %174 {offsets = [0, 96], sizes = [8, 32], strides = [1, 1]} : vector<8x128xf32> to vector<8x32xf32>
    %180 = arith.mulf %177, %158 : vector<8x32xf32>
    %181 = arith.mulf %176, %178 : vector<8x32xf32>
    %182 = arith.addf %180, %181 : vector<8x32xf32>
    %183 = math.tanh %182 : vector<8x32xf32>
    %184 = arith.mulf %179, %183 : vector<8x32xf32>
    %185 = arith.index_cast %164 : i32 to index
    %c0_49 = arith.constant 0 : index
    %186 = vector.load %arg13[%185, %c0_49] : memref<64x32xf32, #tpu.memory_space<vmem>>, vector<8x32xf32>
    tpu.vector_store %arg13[%185, %c0_49], %184 {strides = array<i32>} : memref<64x32xf32, #tpu.memory_space<vmem>>, vector<8x32xf32>,
    %c7_i32 = arith.constant 7 : i32
    %c8_i32_50 = arith.constant 8 : i32
    %187 = arith.muli %c7_i32, %c8_i32_50 : i32
    %188 = tpu.assume_multiple %187, 8 : i32
    %189 = arith.index_cast %188 : i32 to index
    %c0_51 = arith.constant 0 : index
    %190 = vector.load %arg14[%189, %c0_51] : memref<64x128xf32, #tpu.memory_space<vmem>>, vector<8x128xf32>
    %191 = arith.truncf %184 : vector<8x32xf32> to vector<8x32xbf16>
    %cst_52 = arith.constant dense<0.000000e+00> : vector<8x128xf32>
    %192 = tpu.matmul %191, %14, %cst_52 {dimension_numbers = #tpu.dot_dimension_numbers<[1], [0], [0], [1], [0, 0, 1, 1], [], []>} : vector<8x32xbf16>, vector<32x128xbf16>, vector<8x128xf32> -> vector<8x128xf32>
    %193 = arith.addf %190, %192 : vector<8x128xf32>
    %194 = arith.negf %193 : vector<8x128xf32>
    %195 = math.exp %194 : vector<8x128xf32>
    %cst_53 = arith.constant 1.000000e+00 : f32
    %196 = vector.broadcast %cst_53 : f32 to vector<8x128xf32>
    %197 = arith.addf %196, %195 : vector<8x128xf32>
    %198 = arith.divf %196, %197 : vector<8x128xf32>
    %199 = math.tanh %193 : vector<8x128xf32>
    %200 = vector.extract_strided_slice %198 {offsets = [0, 0], sizes = [8, 32], strides = [1, 1]} : vector<8x128xf32> to vector<8x32xf32>
    %201 = vector.extract_strided_slice %198 {offsets = [0, 32], sizes = [8, 32], strides = [1, 1]} : vector<8x128xf32> to vector<8x32xf32>
    %202 = vector.extract_strided_slice %199 {offsets = [0, 64], sizes = [8, 32], strides = [1, 1]} : vector<8x128xf32> to vector<8x32xf32>
    %203 = vector.extract_strided_slice %198 {offsets = [0, 96], sizes = [8, 32], strides = [1, 1]} : vector<8x128xf32> to vector<8x32xf32>
    %204 = arith.mulf %201, %182 : vector<8x32xf32>
    %205 = arith.mulf %200, %202 : vector<8x32xf32>
    %206 = arith.addf %204, %205 : vector<8x32xf32>
    %207 = math.tanh %206 : vector<8x32xf32>
    %208 = arith.mulf %203, %207 : vector<8x32xf32>
    %209 = arith.index_cast %188 : i32 to index
    %c0_54 = arith.constant 0 : index
    %210 = vector.load %arg13[%209, %c0_54] : memref<64x32xf32, #tpu.memory_space<vmem>>, vector<8x32xf32>
    tpu.vector_store %arg13[%209, %c0_54], %208 {strides = array<i32>} : memref<64x32xf32, #tpu.memory_space<vmem>>, vector<8x32xf32>,
    %c8_i32_55 = arith.constant 8 : i32
    %c0_56 = arith.constant 0 : index
    %c0_57 = arith.constant 0 : index
    %c0_58 = arith.constant 0 : index
    %211 = vector.load %arg11[%c0_56, %c0_57, %c0_58] : memref<2x8x32xf32, #tpu.memory_space<vmem>>, vector<1x8x32xf32>
    %212 = vector.shape_cast %211 : vector<1x8x32xf32> to vector<8x32xf32>
    %213 = vector.shape_cast %208 : vector<8x32xf32> to vector<1x8x32xf32>
    tpu.vector_store %arg11[%c0_56, %c0_57, %c0_58], %213 {strides = array<i32>} : memref<2x8x32xf32, #tpu.memory_space<vmem>>, vector<1x8x32xf32>,
    %c0_59 = arith.constant 0 : index
    %c0_60 = arith.constant 0 : index
    %c0_61 = arith.constant 0 : index
    %214 = vector.load %arg12[%c0_59, %c0_60, %c0_61] : memref<2x8x32xf32, #tpu.memory_space<vmem>>, vector<1x8x32xf32>
    %215 = vector.shape_cast %214 : vector<1x8x32xf32> to vector<8x32xf32>
    %216 = vector.shape_cast %206 : vector<8x32xf32> to vector<1x8x32xf32>
    tpu.vector_store %arg12[%c0_59, %c0_60, %c0_61], %216 {strides = array<i32>} : memref<2x8x32xf32, #tpu.memory_space<vmem>>, vector<1x8x32xf32>,
    %c0_62 = arith.constant 0 : index
    %c0_63 = arith.constant 0 : index
    %217 = vector.load %arg13[%c0_62, %c0_63] : memref<64x32xf32, #tpu.memory_space<vmem>>, vector<64x32xf32>
    %218 = arith.truncf %217 : vector<64x32xf32> to vector<64x32xbf16>
    %c0_64 = arith.constant 0 : index
    %c0_65 = arith.constant 0 : index
    %219 = vector.load %arg5[%c0_64, %c0_65] : memref<32x128xbf16, #tpu.memory_space<vmem>>, vector<32x128xbf16>
    %cst_66 = arith.constant dense<0.000000e+00> : vector<64x128xf32>
    %220 = tpu.matmul %218, %219, %cst_66 {dimension_numbers = #tpu.dot_dimension_numbers<[1], [0], [0], [1], [0, 0, 1, 1], [], []>} : vector<64x32xbf16>, vector<32x128xbf16>, vector<64x128xf32> -> vector<64x128xf32>
    %c0_67 = arith.constant 0 : index
    %c0_68 = arith.constant 0 : index
    %221 = vector.load %arg7[%c0_67, %c0_68] : memref<1x128xf32, #tpu.memory_space<vmem>>, vector<1x128xf32>
    %222 = vector.broadcast %221 : vector<1x128xf32> to vector<64x128xf32>
    %223 = arith.addf %220, %222 : vector<64x128xf32>
    %c0_69 = arith.constant 0 : index
    %c0_70 = arith.constant 0 : index
    %224 = vector.load %arg14[%c0_69, %c0_70] : memref<64x128xf32, #tpu.memory_space<vmem>>, vector<64x128xf32>
    tpu.vector_store %arg14[%c0_69, %c0_70], %223 {strides = array<i32>} : memref<64x128xf32, #tpu.memory_space<vmem>>, vector<64x128xf32>,
    %c0_71 = arith.constant 0 : index
    %c0_72 = arith.constant 0 : index
    %225 = vector.load %arg6[%c0_71, %c0_72] : memref<32x128xbf16, #tpu.memory_space<vmem>>, vector<32x128xbf16>
    %c1 = arith.constant 1 : index
    %c0_73 = arith.constant 0 : index
    %c0_74 = arith.constant 0 : index
    %226 = vector.load %arg11[%c1, %c0_73, %c0_74] : memref<2x8x32xf32, #tpu.memory_space<vmem>>, vector<1x8x32xf32>
    %227 = vector.shape_cast %226 : vector<1x8x32xf32> to vector<8x32xf32>
    %c1_75 = arith.constant 1 : index
    %c0_76 = arith.constant 0 : index
    %c0_77 = arith.constant 0 : index
    %228 = vector.load %arg12[%c1_75, %c0_76, %c0_77] : memref<2x8x32xf32, #tpu.memory_space<vmem>>, vector<1x8x32xf32>
    %229 = vector.shape_cast %228 : vector<1x8x32xf32> to vector<8x32xf32>
    %c0_i32_78 = arith.constant 0 : i32
    %c8_i32_79 = arith.constant 8 : i32
    %230 = arith.muli %c0_i32_78, %c8_i32_79 : i32
    %231 = tpu.assume_multiple %230, 8 : i32
    %232 = arith.index_cast %231 : i32 to index
    %c0_80 = arith.constant 0 : index
    %233 = vector.load %arg14[%232, %c0_80] : memref<64x128xf32, #tpu.memory_space<vmem>>, vector<8x128xf32>
    %234 = arith.truncf %227 : vector<8x32xf32> to vector<8x32xbf16>
    %cst_81 = arith.constant dense<0.000000e+00> : vector<8x128xf32>
    %235 = tpu.matmul %234, %225, %cst_81 {dimension_numbers = #tpu.dot_dimension_numbers<[1], [0], [0], [1], [0, 0, 1, 1], [], []>} : vector<8x32xbf16>, vector<32x128xbf16>, vector<8x128xf32> -> vector<8x128xf32>
    %236 = arith.addf %233, %235 : vector<8x128xf32>
    %237 = arith.negf %236 : vector<8x128xf32>
    %238 = math.exp %237 : vector<8x128xf32>
    %cst_82 = arith.constant 1.000000e+00 : f32
    %239 = vector.broadcast %cst_82 : f32 to vector<8x128xf32>
    %240 = arith.addf %239, %238 : vector<8x128xf32>
    %241 = arith.divf %239, %240 : vector<8x128xf32>
    %242 = math.tanh %236 : vector<8x128xf32>
    %243 = vector.extract_strided_slice %241 {offsets = [0, 0], sizes = [8, 32], strides = [1, 1]} : vector<8x128xf32> to vector<8x32xf32>
    %244 = vector.extract_strided_slice %241 {offsets = [0, 32], sizes = [8, 32], strides = [1, 1]} : vector<8x128xf32> to vector<8x32xf32>
    %245 = vector.extract_strided_slice %242 {offsets = [0, 64], sizes = [8, 32], strides = [1, 1]} : vector<8x128xf32> to vector<8x32xf32>
    %246 = vector.extract_strided_slice %241 {offsets = [0, 96], sizes = [8, 32], strides = [1, 1]} : vector<8x128xf32> to vector<8x32xf32>
    %247 = arith.mulf %244, %229 : vector<8x32xf32>
    %248 = arith.mulf %243, %245 : vector<8x32xf32>
    %249 = arith.addf %247, %248 : vector<8x32xf32>
    %250 = math.tanh %249 : vector<8x32xf32>
    %251 = arith.mulf %246, %250 : vector<8x32xf32>
    %c1_i32_83 = arith.constant 1 : i32
    %c8_i32_84 = arith.constant 8 : i32
    %252 = arith.muli %c1_i32_83, %c8_i32_84 : i32
    %253 = tpu.assume_multiple %252, 8 : i32
    %254 = arith.index_cast %253 : i32 to index
    %c0_85 = arith.constant 0 : index
    %255 = vector.load %arg14[%254, %c0_85] : memref<64x128xf32, #tpu.memory_space<vmem>>, vector<8x128xf32>
    %256 = arith.truncf %251 : vector<8x32xf32> to vector<8x32xbf16>
    %cst_86 = arith.constant dense<0.000000e+00> : vector<8x128xf32>
    %257 = tpu.matmul %256, %225, %cst_86 {dimension_numbers = #tpu.dot_dimension_numbers<[1], [0], [0], [1], [0, 0, 1, 1], [], []>} : vector<8x32xbf16>, vector<32x128xbf16>, vector<8x128xf32> -> vector<8x128xf32>
    %258 = arith.addf %255, %257 : vector<8x128xf32>
    %259 = arith.negf %258 : vector<8x128xf32>
    %260 = math.exp %259 : vector<8x128xf32>
    %cst_87 = arith.constant 1.000000e+00 : f32
    %261 = vector.broadcast %cst_87 : f32 to vector<8x128xf32>
    %262 = arith.addf %261, %260 : vector<8x128xf32>
    %263 = arith.divf %261, %262 : vector<8x128xf32>
    %264 = math.tanh %258 : vector<8x128xf32>
    %265 = vector.extract_strided_slice %263 {offsets = [0, 0], sizes = [8, 32], strides = [1, 1]} : vector<8x128xf32> to vector<8x32xf32>
    %266 = vector.extract_strided_slice %263 {offsets = [0, 32], sizes = [8, 32], strides = [1, 1]} : vector<8x128xf32> to vector<8x32xf32>
    %267 = vector.extract_strided_slice %264 {offsets = [0, 64], sizes = [8, 32], strides = [1, 1]} : vector<8x128xf32> to vector<8x32xf32>
    %268 = vector.extract_strided_slice %263 {offsets = [0, 96], sizes = [8, 32], strides = [1, 1]} : vector<8x128xf32> to vector<8x32xf32>
    %269 = arith.mulf %266, %249 : vector<8x32xf32>
    %270 = arith.mulf %265, %267 : vector<8x32xf32>
    %271 = arith.addf %269, %270 : vector<8x32xf32>
    %272 = math.tanh %271 : vector<8x32xf32>
    %273 = arith.mulf %268, %272 : vector<8x32xf32>
    %c2_i32_88 = arith.constant 2 : i32
    %c8_i32_89 = arith.constant 8 : i32
    %274 = arith.muli %c2_i32_88, %c8_i32_89 : i32
    %275 = tpu.assume_multiple %274, 8 : i32
    %276 = arith.index_cast %275 : i32 to index
    %c0_90 = arith.constant 0 : index
    %277 = vector.load %arg14[%276, %c0_90] : memref<64x128xf32, #tpu.memory_space<vmem>>, vector<8x128xf32>
    %278 = arith.truncf %273 : vector<8x32xf32> to vector<8x32xbf16>
    %cst_91 = arith.constant dense<0.000000e+00> : vector<8x128xf32>
    %279 = tpu.matmul %278, %225, %cst_91 {dimension_numbers = #tpu.dot_dimension_numbers<[1], [0], [0], [1], [0, 0, 1, 1], [], []>} : vector<8x32xbf16>, vector<32x128xbf16>, vector<8x128xf32> -> vector<8x128xf32>
    %280 = arith.addf %277, %279 : vector<8x128xf32>
    %281 = arith.negf %280 : vector<8x128xf32>
    %282 = math.exp %281 : vector<8x128xf32>
    %cst_92 = arith.constant 1.000000e+00 : f32
    %283 = vector.broadcast %cst_92 : f32 to vector<8x128xf32>
    %284 = arith.addf %283, %282 : vector<8x128xf32>
    %285 = arith.divf %283, %284 : vector<8x128xf32>
    %286 = math.tanh %280 : vector<8x128xf32>
    %287 = vector.extract_strided_slice %285 {offsets = [0, 0], sizes = [8, 32], strides = [1, 1]} : vector<8x128xf32> to vector<8x32xf32>
    %288 = vector.extract_strided_slice %285 {offsets = [0, 32], sizes = [8, 32], strides = [1, 1]} : vector<8x128xf32> to vector<8x32xf32>
    %289 = vector.extract_strided_slice %286 {offsets = [0, 64], sizes = [8, 32], strides = [1, 1]} : vector<8x128xf32> to vector<8x32xf32>
    %290 = vector.extract_strided_slice %285 {offsets = [0, 96], sizes = [8, 32], strides = [1, 1]} : vector<8x128xf32> to vector<8x32xf32>
    %291 = arith.mulf %288, %271 : vector<8x32xf32>
    %292 = arith.mulf %287, %289 : vector<8x32xf32>
    %293 = arith.addf %291, %292 : vector<8x32xf32>
    %294 = math.tanh %293 : vector<8x32xf32>
    %295 = arith.mulf %290, %294 : vector<8x32xf32>
    %c3_i32_93 = arith.constant 3 : i32
    %c8_i32_94 = arith.constant 8 : i32
    %296 = arith.muli %c3_i32_93, %c8_i32_94 : i32
    %297 = tpu.assume_multiple %296, 8 : i32
    %298 = arith.index_cast %297 : i32 to index
    %c0_95 = arith.constant 0 : index
    %299 = vector.load %arg14[%298, %c0_95] : memref<64x128xf32, #tpu.memory_space<vmem>>, vector<8x128xf32>
    %300 = arith.truncf %295 : vector<8x32xf32> to vector<8x32xbf16>
    %cst_96 = arith.constant dense<0.000000e+00> : vector<8x128xf32>
    %301 = tpu.matmul %300, %225, %cst_96 {dimension_numbers = #tpu.dot_dimension_numbers<[1], [0], [0], [1], [0, 0, 1, 1], [], []>} : vector<8x32xbf16>, vector<32x128xbf16>, vector<8x128xf32> -> vector<8x128xf32>
    %302 = arith.addf %299, %301 : vector<8x128xf32>
    %303 = arith.negf %302 : vector<8x128xf32>
    %304 = math.exp %303 : vector<8x128xf32>
    %cst_97 = arith.constant 1.000000e+00 : f32
    %305 = vector.broadcast %cst_97 : f32 to vector<8x128xf32>
    %306 = arith.addf %305, %304 : vector<8x128xf32>
    %307 = arith.divf %305, %306 : vector<8x128xf32>
    %308 = math.tanh %302 : vector<8x128xf32>
    %309 = vector.extract_strided_slice %307 {offsets = [0, 0], sizes = [8, 32], strides = [1, 1]} : vector<8x128xf32> to vector<8x32xf32>
    %310 = vector.extract_strided_slice %307 {offsets = [0, 32], sizes = [8, 32], strides = [1, 1]} : vector<8x128xf32> to vector<8x32xf32>
    %311 = vector.extract_strided_slice %308 {offsets = [0, 64], sizes = [8, 32], strides = [1, 1]} : vector<8x128xf32> to vector<8x32xf32>
    %312 = vector.extract_strided_slice %307 {offsets = [0, 96], sizes = [8, 32], strides = [1, 1]} : vector<8x128xf32> to vector<8x32xf32>
    %313 = arith.mulf %310, %293 : vector<8x32xf32>
    %314 = arith.mulf %309, %311 : vector<8x32xf32>
    %315 = arith.addf %313, %314 : vector<8x32xf32>
    %316 = math.tanh %315 : vector<8x32xf32>
    %317 = arith.mulf %312, %316 : vector<8x32xf32>
    %c4_i32_98 = arith.constant 4 : i32
    %c8_i32_99 = arith.constant 8 : i32
    %318 = arith.muli %c4_i32_98, %c8_i32_99 : i32
    %319 = tpu.assume_multiple %318, 8 : i32
    %320 = arith.index_cast %319 : i32 to index
    %c0_100 = arith.constant 0 : index
    %321 = vector.load %arg14[%320, %c0_100] : memref<64x128xf32, #tpu.memory_space<vmem>>, vector<8x128xf32>
    %322 = arith.truncf %317 : vector<8x32xf32> to vector<8x32xbf16>
    %cst_101 = arith.constant dense<0.000000e+00> : vector<8x128xf32>
    %323 = tpu.matmul %322, %225, %cst_101 {dimension_numbers = #tpu.dot_dimension_numbers<[1], [0], [0], [1], [0, 0, 1, 1], [], []>} : vector<8x32xbf16>, vector<32x128xbf16>, vector<8x128xf32> -> vector<8x128xf32>
    %324 = arith.addf %321, %323 : vector<8x128xf32>
    %325 = arith.negf %324 : vector<8x128xf32>
    %326 = math.exp %325 : vector<8x128xf32>
    %cst_102 = arith.constant 1.000000e+00 : f32
    %327 = vector.broadcast %cst_102 : f32 to vector<8x128xf32>
    %328 = arith.addf %327, %326 : vector<8x128xf32>
    %329 = arith.divf %327, %328 : vector<8x128xf32>
    %330 = math.tanh %324 : vector<8x128xf32>
    %331 = vector.extract_strided_slice %329 {offsets = [0, 0], sizes = [8, 32], strides = [1, 1]} : vector<8x128xf32> to vector<8x32xf32>
    %332 = vector.extract_strided_slice %329 {offsets = [0, 32], sizes = [8, 32], strides = [1, 1]} : vector<8x128xf32> to vector<8x32xf32>
    %333 = vector.extract_strided_slice %330 {offsets = [0, 64], sizes = [8, 32], strides = [1, 1]} : vector<8x128xf32> to vector<8x32xf32>
    %334 = vector.extract_strided_slice %329 {offsets = [0, 96], sizes = [8, 32], strides = [1, 1]} : vector<8x128xf32> to vector<8x32xf32>
    %335 = arith.mulf %332, %315 : vector<8x32xf32>
    %336 = arith.mulf %331, %333 : vector<8x32xf32>
    %337 = arith.addf %335, %336 : vector<8x32xf32>
    %338 = math.tanh %337 : vector<8x32xf32>
    %339 = arith.mulf %334, %338 : vector<8x32xf32>
    %c5_i32_103 = arith.constant 5 : i32
    %c8_i32_104 = arith.constant 8 : i32
    %340 = arith.muli %c5_i32_103, %c8_i32_104 : i32
    %341 = tpu.assume_multiple %340, 8 : i32
    %342 = arith.index_cast %341 : i32 to index
    %c0_105 = arith.constant 0 : index
    %343 = vector.load %arg14[%342, %c0_105] : memref<64x128xf32, #tpu.memory_space<vmem>>, vector<8x128xf32>
    %344 = arith.truncf %339 : vector<8x32xf32> to vector<8x32xbf16>
    %cst_106 = arith.constant dense<0.000000e+00> : vector<8x128xf32>
    %345 = tpu.matmul %344, %225, %cst_106 {dimension_numbers = #tpu.dot_dimension_numbers<[1], [0], [0], [1], [0, 0, 1, 1], [], []>} : vector<8x32xbf16>, vector<32x128xbf16>, vector<8x128xf32> -> vector<8x128xf32>
    %346 = arith.addf %343, %345 : vector<8x128xf32>
    %347 = arith.negf %346 : vector<8x128xf32>
    %348 = math.exp %347 : vector<8x128xf32>
    %cst_107 = arith.constant 1.000000e+00 : f32
    %349 = vector.broadcast %cst_107 : f32 to vector<8x128xf32>
    %350 = arith.addf %349, %348 : vector<8x128xf32>
    %351 = arith.divf %349, %350 : vector<8x128xf32>
    %352 = math.tanh %346 : vector<8x128xf32>
    %353 = vector.extract_strided_slice %351 {offsets = [0, 0], sizes = [8, 32], strides = [1, 1]} : vector<8x128xf32> to vector<8x32xf32>
    %354 = vector.extract_strided_slice %351 {offsets = [0, 32], sizes = [8, 32], strides = [1, 1]} : vector<8x128xf32> to vector<8x32xf32>
    %355 = vector.extract_strided_slice %352 {offsets = [0, 64], sizes = [8, 32], strides = [1, 1]} : vector<8x128xf32> to vector<8x32xf32>
    %356 = vector.extract_strided_slice %351 {offsets = [0, 96], sizes = [8, 32], strides = [1, 1]} : vector<8x128xf32> to vector<8x32xf32>
    %357 = arith.mulf %354, %337 : vector<8x32xf32>
    %358 = arith.mulf %353, %355 : vector<8x32xf32>
    %359 = arith.addf %357, %358 : vector<8x32xf32>
    %360 = math.tanh %359 : vector<8x32xf32>
    %361 = arith.mulf %356, %360 : vector<8x32xf32>
    %c6_i32_108 = arith.constant 6 : i32
    %c8_i32_109 = arith.constant 8 : i32
    %362 = arith.muli %c6_i32_108, %c8_i32_109 : i32
    %363 = tpu.assume_multiple %362, 8 : i32
    %364 = arith.index_cast %363 : i32 to index
    %c0_110 = arith.constant 0 : index
    %365 = vector.load %arg14[%364, %c0_110] : memref<64x128xf32, #tpu.memory_space<vmem>>, vector<8x128xf32>
    %366 = arith.truncf %361 : vector<8x32xf32> to vector<8x32xbf16>
    %cst_111 = arith.constant dense<0.000000e+00> : vector<8x128xf32>
    %367 = tpu.matmul %366, %225, %cst_111 {dimension_numbers = #tpu.dot_dimension_numbers<[1], [0], [0], [1], [0, 0, 1, 1], [], []>} : vector<8x32xbf16>, vector<32x128xbf16>, vector<8x128xf32> -> vector<8x128xf32>
    %368 = arith.addf %365, %367 : vector<8x128xf32>
    %369 = arith.negf %368 : vector<8x128xf32>
    %370 = math.exp %369 : vector<8x128xf32>
    %cst_112 = arith.constant 1.000000e+00 : f32
    %371 = vector.broadcast %cst_112 : f32 to vector<8x128xf32>
    %372 = arith.addf %371, %370 : vector<8x128xf32>
    %373 = arith.divf %371, %372 : vector<8x128xf32>
    %374 = math.tanh %368 : vector<8x128xf32>
    %375 = vector.extract_strided_slice %373 {offsets = [0, 0], sizes = [8, 32], strides = [1, 1]} : vector<8x128xf32> to vector<8x32xf32>
    %376 = vector.extract_strided_slice %373 {offsets = [0, 32], sizes = [8, 32], strides = [1, 1]} : vector<8x128xf32> to vector<8x32xf32>
    %377 = vector.extract_strided_slice %374 {offsets = [0, 64], sizes = [8, 32], strides = [1, 1]} : vector<8x128xf32> to vector<8x32xf32>
    %378 = vector.extract_strided_slice %373 {offsets = [0, 96], sizes = [8, 32], strides = [1, 1]} : vector<8x128xf32> to vector<8x32xf32>
    %379 = arith.mulf %376, %359 : vector<8x32xf32>
    %380 = arith.mulf %375, %377 : vector<8x32xf32>
    %381 = arith.addf %379, %380 : vector<8x32xf32>
    %382 = math.tanh %381 : vector<8x32xf32>
    %383 = arith.mulf %378, %382 : vector<8x32xf32>
    %c7_i32_113 = arith.constant 7 : i32
    %c8_i32_114 = arith.constant 8 : i32
    %384 = arith.muli %c7_i32_113, %c8_i32_114 : i32
    %385 = tpu.assume_multiple %384, 8 : i32
    %386 = arith.index_cast %385 : i32 to index
    %c0_115 = arith.constant 0 : index
    %387 = vector.load %arg14[%386, %c0_115] : memref<64x128xf32, #tpu.memory_space<vmem>>, vector<8x128xf32>
    %388 = arith.truncf %383 : vector<8x32xf32> to vector<8x32xbf16>
    %cst_116 = arith.constant dense<0.000000e+00> : vector<8x128xf32>
    %389 = tpu.matmul %388, %225, %cst_116 {dimension_numbers = #tpu.dot_dimension_numbers<[1], [0], [0], [1], [0, 0, 1, 1], [], []>} : vector<8x32xbf16>, vector<32x128xbf16>, vector<8x128xf32> -> vector<8x128xf32>
    %390 = arith.addf %387, %389 : vector<8x128xf32>
    %391 = arith.negf %390 : vector<8x128xf32>
    %392 = math.exp %391 : vector<8x128xf32>
    %cst_117 = arith.constant 1.000000e+00 : f32
    %393 = vector.broadcast %cst_117 : f32 to vector<8x128xf32>
    %394 = arith.addf %393, %392 : vector<8x128xf32>
    %395 = arith.divf %393, %394 : vector<8x128xf32>
    %396 = math.tanh %390 : vector<8x128xf32>
    %397 = vector.extract_strided_slice %395 {offsets = [0, 0], sizes = [8, 32], strides = [1, 1]} : vector<8x128xf32> to vector<8x32xf32>
    %398 = vector.extract_strided_slice %395 {offsets = [0, 32], sizes = [8, 32], strides = [1, 1]} : vector<8x128xf32> to vector<8x32xf32>
    %399 = vector.extract_strided_slice %396 {offsets = [0, 64], sizes = [8, 32], strides = [1, 1]} : vector<8x128xf32> to vector<8x32xf32>
    %400 = vector.extract_strided_slice %395 {offsets = [0, 96], sizes = [8, 32], strides = [1, 1]} : vector<8x128xf32> to vector<8x32xf32>
    %401 = arith.mulf %398, %381 : vector<8x32xf32>
    %402 = arith.mulf %397, %399 : vector<8x32xf32>
    %403 = arith.addf %401, %402 : vector<8x32xf32>
    %404 = math.tanh %403 : vector<8x32xf32>
    %405 = arith.mulf %400, %404 : vector<8x32xf32>
    %c8_i32_118 = arith.constant 8 : i32
    %c1_119 = arith.constant 1 : index
    %c0_120 = arith.constant 0 : index
    %c0_121 = arith.constant 0 : index
    %406 = vector.load %arg11[%c1_119, %c0_120, %c0_121] : memref<2x8x32xf32, #tpu.memory_space<vmem>>, vector<1x8x32xf32>
    %407 = vector.shape_cast %406 : vector<1x8x32xf32> to vector<8x32xf32>
    %408 = vector.shape_cast %405 : vector<8x32xf32> to vector<1x8x32xf32>
    tpu.vector_store %arg11[%c1_119, %c0_120, %c0_121], %408 {strides = array<i32>} : memref<2x8x32xf32, #tpu.memory_space<vmem>>, vector<1x8x32xf32>,
    %c1_122 = arith.constant 1 : index
    %c0_123 = arith.constant 0 : index
    %c0_124 = arith.constant 0 : index
    %409 = vector.load %arg12[%c1_122, %c0_123, %c0_124] : memref<2x8x32xf32, #tpu.memory_space<vmem>>, vector<1x8x32xf32>
    %410 = vector.shape_cast %409 : vector<1x8x32xf32> to vector<8x32xf32>
    %411 = vector.shape_cast %403 : vector<8x32xf32> to vector<1x8x32xf32>
    tpu.vector_store %arg12[%c1_122, %c0_123, %c0_124], %411 {strides = array<i32>} : memref<2x8x32xf32, #tpu.memory_space<vmem>>, vector<1x8x32xf32>,
    %c0_i32_125 = arith.constant 0 : i32
    %412 = arith.cmpi eq, %arg0, %c0_i32_125 : i32
    %413 = arith.extui %412 : i1 to i32
    %c0_i32_126 = arith.constant 0 : i32
    %414 = arith.cmpi ne, %413, %c0_i32_126 : i32
    scf.if %414 {
      %c1_127 = arith.constant 1 : index
      %c0_128 = arith.constant 0 : index
      %c0_129 = arith.constant 0 : index
      %415 = vector.load %arg11[%c1_127, %c0_128, %c0_129] : memref<2x8x32xf32, #tpu.memory_space<vmem>>, vector<1x8x32xf32>
      %416 = vector.shape_cast %415 : vector<1x8x32xf32> to vector<8x32xf32>
      %c0_130 = arith.constant 0 : index
      %c0_131 = arith.constant 0 : index
      %417 = vector.load %arg8[%c0_130, %c0_131] : memref<1x32xf32, #tpu.memory_space<vmem>>, vector<1x32xf32>
      %418 = vector.broadcast %417 : vector<1x32xf32> to vector<8x32xf32>
      %419 = arith.mulf %416, %418 : vector<8x32xf32>
      %cst_132 = arith.constant dense<0.000000e+00> : vector<8xf32>
      %420 = vector.multi_reduction <add>, %419, %cst_132 [1] : vector<8x32xf32> to vector<8xf32>
      %421 = vector.shape_cast %420 : vector<8xf32> to vector<8x1xf32>
      %c0_133 = arith.constant 0 : index
      %c0_134 = arith.constant 0 : index
      %422 = vector.load %arg9[%c0_133, %c0_134] : memref<1x1xf32, #tpu.memory_space<vmem>>, vector<1x1xf32>
      %423 = vector.broadcast %422 : vector<1x1xf32> to vector<8x1xf32>
      %424 = arith.addf %421, %423 : vector<8x1xf32>
      %c0_135 = arith.constant 0 : index
      %c0_136 = arith.constant 0 : index
      %425 = vector.load %arg10[%c0_135, %c0_136] : memref<8x1xf32, #tpu.memory_space<vmem>>, vector<8x1xf32>
      tpu.vector_store %arg10[%c0_135, %c0_136], %424 {strides = array<i32>} : memref<8x1xf32, #tpu.memory_space<vmem>>, vector<8x1xf32>,
    } else {
    }
    return
  }
  func.func @transform_0(%arg0: i32) -> (i32, i32) {
    %c0_i32 = arith.constant 0 : i32
    %c0_i32_0 = arith.constant 0 : i32
    %c0_i32_1 = arith.constant 0 : i32
    return %c0_i32, %c0_i32_0 : i32, i32
  }
  func.func @transform_1(%arg0: i32) -> (i32, i32) {
    %c0_i32 = arith.constant 0 : i32
    %c0_i32_0 = arith.constant 0 : i32
    %c0_i32_1 = arith.constant 0 : i32
    return %c0_i32, %c0_i32_0 : i32, i32
  }
  func.func @transform_2(%arg0: i32) -> (i32, i32) {
    %c0_i32 = arith.constant 0 : i32
    %c0_i32_0 = arith.constant 0 : i32
    %c0_i32_1 = arith.constant 0 : i32
    return %c0_i32, %c0_i32_0 : i32, i32
  }
  func.func @transform_3(%arg0: i32) -> (i32, i32) {
    %c0_i32 = arith.constant 0 : i32
    %c0_i32_0 = arith.constant 0 : i32
    %c0_i32_1 = arith.constant 0 : i32
    return %c0_i32, %c0_i32_0 : i32, i32
  }
  func.func @transform_4(%arg0: i32) -> (i32, i32) {
    %c0_i32 = arith.constant 0 : i32
    %c0_i32_0 = arith.constant 0 : i32
    %c0_i32_1 = arith.constant 0 : i32
    return %c0_i32, %c0_i32_0 : i32, i32
  }
  func.func @transform_5(%arg0: i32) -> (i32, i32) {
    %c0_i32 = arith.constant 0 : i32
    %c0_i32_0 = arith.constant 0 : i32
    %c0_i32_1 = arith.constant 0 : i32
    return %c0_i32, %c0_i32_0 : i32, i32
  }
  func.func @transform_6(%arg0: i32) -> (i32, i32) {
    %c0_i32 = arith.constant 0 : i32
    %c0_i32_0 = arith.constant 0 : i32
    %c0_i32_1 = arith.constant 0 : i32
    return %c0_i32, %c0_i32_0 : i32, i32
  }
  func.func @transform_7(%arg0: i32) -> (i32, i32) {
    %c0_i32 = arith.constant 0 : i32
    %c0_i32_0 = arith.constant 0 : i32
    %c0_i32_1 = arith.constant 0 : i32
    return %c0_i32, %c0_i32_0 : i32, i32
  }
  func.func @transform_8(%arg0: i32) -> (i32, i32) {
    %c0_i32 = arith.constant 0 : i32
    %c0_i32_0 = arith.constant 0 : i32
    %c0_i32_1 = arith.constant 0 : i32
    return %c0_i32, %c0_i32_0 : i32, i32
  }
  func.func @transform_9(%arg0: i32) -> (i32, i32) {
    %c0_i32 = arith.constant 0 : i32
    %c0_i32_0 = arith.constant 0 : i32
    %c0_i32_1 = arith.constant 0 : i32
    return %c0_i32, %c0_i32_0 : i32, i32
  }
}

</mosaic_0001>

<bundles_post_ra>
// kernel: tpu_custom_call.1
= control target key start
LH: loop header
LB: loop body
LE: loop exit
PB: predicated region body
PF: predicated region fallthrough
CT: control target
= control target key end

     0   :  { %vm78_vm0 = vcmask 1041408   ;;  %vm39_vm1 = vcmask 261120   ;;  %v1485_v3 = vmov 0.0   ;;  %vm65_vm2 = vcmask 31744   ;;  %s1486_s19 = smov 64   ;;  %s1487_s20 = smov 32   ;;  %s1840_s1 = inlined_call_operand.vmem [shape: bf16[4,128], index: 1, kind: input, shape index: {}]   ;;  %s1841_s2 = inlined_call_operand.vmem [shape: bf16[32,128], index: 2, kind: input, shape index: {}]   ;;  %s1842_s0 = inlined_call_operand.vmem [shape: f32[64,4], index: 0, kind: input, shape index: {}]   ;;  %s1843_s3 = inlined_call_operand.vmem [shape: f32[1,128], index: 3, kind: input, shape index: {}]   ;;  %s1844_s4 = inlined_call_operand.vmem [shape: bf16[32,128], index: 4, kind: input, shape index: {}]   ;;  %s1845_s6 = inlined_call_operand.vmem [shape: f32[1,128], index: 6, kind: input, shape index: {}]   ;;  %s1846_s5 = inlined_call_operand.vmem [shape: bf16[32,128], index: 5, kind: input, shape index: {}]   ;;  %s1847_s7 = inlined_call_operand.vmem [shape: f32[1,32], index: 7, kind: input, shape index: {}]   ;;  %s1848_s8 = inlined_call_operand.<no memory space> [shape: f32[1,1], index: 8, kind: input, shape index: {}]   ;;  %s1849_s9 = inlined_call_operand.vmem [shape: f32[8,1], index: 9, kind: output, shape index: {}]  }
   0x1   :  { %v60_v0 = vld [vmem:[%s1840_s1] sm:$0x3]  ;;  %v1545_v1 = vld [vmem:[%s1841_s2 + $0x8] sm:$0xff]  ;;  %40 = vst.msk [vmem:[#allocation2] sm:$0xff] %vm39_vm1, %v1485_v3 }
   0x2   :  { %v48_v2 = vld [vmem:[%s1842_s0] sm:$0xff]  ;;  %v80_v4 = vsel %vm78_vm0, %v60_v0, 0  ;;  %v49_v5 = vld [vmem:[%s1842_s0 + $0x8] sm:$0xff]  ;;  %41 = vst.msk [vmem:[#allocation2 + $0x8] sm:$0xff] %vm39_vm1, %v1485_v3  ;;  %149 = vmatpush.bf16.msra.mxu1 %v1545_v1  ;;  %218 = vmatpush.bf16.msra.mxu2 %v1545_v1 }
   0x3   :  { %89 = vmatpush.bf16.msra.mxu0 %v80_v4  ;;  %v56_v6 = vpack.c.bf16 %v49_v5, %v48_v2  ;;  %v1561_v7 = vld [vmem:[%s1841_s2] sm:$0xff]  ;;  %42 = vst.msk [vmem:[#allocation3] sm:$0xff] %vm39_vm1, %v1485_v3  ;;  %284 = vmatpush.bf16.msra.mxu3 %v1545_v1  ;;  %v50_v4 = vld [vmem:[%s1842_s0 + $0x10] sm:$0xff]  ;;  %v51_v5 = vld [vmem:[%s1842_s0 + $0x18] sm:$0xff] }
   0x4   :  { %43 = vst.msk [vmem:[#allocation3 + $0x8] sm:$0xff] %vm39_vm1, %v1485_v3  ;;  %v1585_v10 = vld [vmem:[%s1843_s3] ss:$0 sm:$0xff] }
   0x6   :  { %1278 = vmatmul.msk.bf16.vlgmr.msra.gmra.mxu0 %vm65_vm2, %v56_v6  ;;  %150 = vmatpush.bf16.msra.mxu1 %v1561_v7  ;;  %v57_v6 = vpack.c.bf16 %v51_v5, %v50_v4  ;;  %v52_v4 = vld [vmem:[%s1842_s0 + $0x20] sm:$0xff]  ;;  %v53_v5 = vld [vmem:[%s1842_s0 + $0x28] sm:$0xff] }
   0x7   :  { %219 = vmatpush.bf16.msra.mxu2 %v1561_v7  ;;  %285 = vmatpush.bf16.msra.mxu3 %v1561_v7 }
   0x8   :  { %v123_v8 = vld [vmem:[#allocation2] sm:$0xff] }
   0x9   :  { %v126_v9 = vpack.c.bf16 %v123_v8, %v123_v8 }
   0xa   :  { %350 = vmatpush.bf16.msrb.mxu1 %v1545_v1  ;;  %v124_v17 = vld [vmem:[#allocation3] sm:$0xff] }
   0xb   :  { %416 = vmatpush.bf16.msrb.mxu2 %v1545_v1  ;;  %482 = vmatpush.bf16.msrb.mxu3 %v1545_v1 }
   0xc   :  { %1290 = vmatmul.msk.bf16.vlgmr.msra.gmra.mxu1 %vm39_vm1, %v126_v9 }
   0xe   :  { %351 = vmatpush.bf16.msrb.mxu1 %v1561_v7 }
   0xf   :  { %417 = vmatpush.bf16.msrb.mxu2 %v1561_v7  ;;  %483 = vmatpush.bf16.msrb.mxu3 %v1561_v7 }
  0x12   :  { %548 = vmatpush.bf16.msra.mxu1 %v1545_v1 }
  0x16   :  { %549 = vmatpush.bf16.msra.mxu1 %v1561_v7  ;;  %1279 = vmatmul.msk.bf16.gmra.mxu0 %vm65_vm2, %v57_v6  ;;  %v58_v6 = vpack.c.bf16 %v53_v5, %v52_v4 }
  0x26   :  { %1280 = vmatmul.msk.bf16.gmra.mxu0 %vm65_vm2, %v58_v6 }
  0x83   :  { %v91_v11 = vpop.f32.mrf.mxu0 }
  0x84   :  { %v92_v12 = vadd.f32 %v1585_v10, %v91_v11 }
  0x89   :  { %v152_v13 = vpop.f32.mrf.mxu1 }
  0x8a   :  { %v156_v14 = vadd.f32 %v152_v13, %v92_v12 }
  0x8b   :  { %v93_v42 = vpop.f32.mrf.mxu0 }
  0x8c   :  { %1356 = vtanh.f32 %v156_v14  ;;  %v1291_v18 = vmul.f32 -1.442695, %v156_v14  ;;  %v94_v43 = vadd.f32 %v1585_v10, %v93_v42 }
  0x8e   :  { %1358 = vpow2.f32 %v1291_v18 }
  0x91   :  { %v154_v15 = vpop.f32.mrf.mxu1 }
  0x92   :  { %v1357_v16 = vpop.eup %1356 }
  0x93   :  { %183 = vrot.lane.b32.xlu0 %v1357_v16, %s1486_s19  ;;  %v96_v12 = vpop.f32.mrf.mxu0 }
  0x94   :  { %v1359_v19 = vpop.eup %1358  ;;  %v97_v13 = vadd.f32 %v1585_v10, %v96_v12 }
  0x95   :  { %v160_v20 = vadd.f32 1.0, %v1359_v19 }
  0x97   :  { %1360 = vrcp.f32 %v160_v20  ;;  %v172_v26 = vand.u32 2147483648, %v160_v20  ;;  %vm166_vm4 = vweird.f32 %v160_v20  ;;  %v170_v27 = vand.u32 2147483647, %v160_v20 }
  0x99   :  { %v173_v29 = vor.u32 1.1754944e-38, %v172_v26  ;;  %vm171_vm6 = vcmp.eq.f32.partialorder %v170_v27, 8.507059e+37 }
  0x9b   :  { %178 = vrot.lane.b32.xlu0 %v124_v17, %s1487_s20  ;;  %v98_v42 = vpop.f32.mrf.mxu0 }
  0x9d   :  { %v1361_v21 = vpop.eup %1360 }
  0x9e   :  { %v162_v22 = vmul.f32 %v1361_v21, %v160_v20  ;;  %vm167_vm3 = vweird.f32 %v1361_v21 }
  0x9f   :  { %vm168_vm5 = vmor %vm166_vm4, %vm167_vm3 }
  0xa0   :  { %v163_v23 = vsub.f32 1.0, %v162_v22 }
  0xa2   :  { %v164_v24 = vmul.f32 %v1361_v21, %v163_v23 }
  0xa4   :  { %v165_v25 = vadd.f32 %v1361_v21, %v164_v24 }
  0xa6   :  { %v169_v28 = vsel %vm168_vm5, %v1361_v21, %v165_v25 }
  0xa7   :  { %v174_v31 = vsel %vm171_vm6, %v173_v29, %v169_v28 }
 0x105   :  { %v184_v30 = vpop.permute.xlu0 %183 }
 0x106   :  { %v186_v32 = vmul.f32 %v184_v30, %v174_v31 }
 0x108   :  { %188 = vrot.lane.b32.xlu1 %v186_v32, %s1487_s20 }
 0x10d   :  { %v179_v33 = vpop.permute.xlu0 %178 }
 0x10e   :  { %v181_v34 = vmul.f32 %v179_v33, %v174_v31 }
 0x17a   :  { %v189_v35 = vpop.permute.xlu1 %188 }
 0x17b   :  { %v191_v36 = vadd.f32 %v189_v35, %v181_v34 }
 0x17d   :  { %1362 = vtanh.f32 %v191_v36 }
 0x183   :  { %v1363_v37 = vpop.eup %1362 }
 0x184   :  { %194 = vrot.lane.b32.xlu1 %v1363_v37, %s1486_s19 }
 0x1f6   :  { %v195_v38 = vpop.permute.xlu1 %194 }
 0x1f7   :  { %v1592_v39 = vmul.f32 %v195_v38, %v174_v31 }
 0x1f9   :  { %v205_v40 = vpack.c.bf16 %v1592_v39, %v1592_v39 }
 0x1fb   :  { %207 = vrot.lane.b32.xlu2 %v205_v40, %s1487_s20 }
 0x255   :  { %v208_v41 = vpop.permute.xlu2 %207 }
 0x256   :  { %1292 = vmatmul.msk.bf16.vlgmr.msra.gmra.mxu2 %vm39_vm1, %v208_v41 }
 0x257   :  { %614 = vmatpush.bf16.msra.mxu2 %v1545_v1 }
 0x25b   :  { %615 = vmatpush.bf16.msra.mxu2 %v1561_v7 }
 0x2d9   :  { %v221_v44 = vpop.f32.mrf.mxu2 }
 0x2da   :  { %v225_v45 = vadd.f32 %v221_v44, %v94_v43  ;;  %v99_v43 = vadd.f32 %v1585_v10, %v98_v42 }
 0x2dc   :  { %1364 = vtanh.f32 %v225_v45  ;;  %v1293_v48 = vmul.f32 -1.442695, %v225_v45 }
 0x2de   :  { %1366 = vpow2.f32 %v1293_v48 }
 0x2e1   :  { %v223_v46 = vpop.f32.mrf.mxu2 }
 0x2e2   :  { %v1365_v47 = vpop.eup %1364 }
 0x2e3   :  { %248 = vrot.lane.b32.xlu2 %v1365_v47, %s1486_s19 }
 0x2e4   :  { %v1367_v49 = vpop.eup %1366 }
 0x2e5   :  { %v229_v50 = vadd.f32 1.0, %v1367_v49 }
 0x2e7   :  { %1368 = vrcp.f32 %v229_v50  ;;  %v241_v56 = vand.u32 2147483648, %v229_v50  ;;  %vm235_vm8 = vweird.f32 %v229_v50  ;;  %v239_v57 = vand.u32 2147483647, %v229_v50 }
 0x2e9   :  { %v242_v59 = vor.u32 1.1754944e-38, %v241_v56  ;;  %vm240_vm10 = vcmp.eq.f32.partialorder %v239_v57, 8.507059e+37 }
 0x2ed   :  { %v1369_v51 = vpop.eup %1368 }
 0x2ee   :  { %v231_v52 = vmul.f32 %v1369_v51, %v229_v50  ;;  %vm236_vm7 = vweird.f32 %v1369_v51 }
 0x2ef   :  { %vm237_vm9 = vmor %vm235_vm8, %vm236_vm7 }
 0x2f0   :  { %v232_v53 = vsub.f32 1.0, %v231_v52 }
 0x2f2   :  { %v233_v54 = vmul.f32 %v1369_v51, %v232_v53 }
 0x2f4   :  { %v234_v55 = vadd.f32 %v1369_v51, %v233_v54 }
 0x2f6   :  { %v238_v58 = vsel %vm237_vm9, %v1369_v51, %v234_v55 }
 0x2f7   :  { %v243_v61 = vsel %vm240_vm10, %v242_v59, %v238_v58 }
 0x2f8   :  { %v246_v63 = vmul.f32 %v243_v61, %v191_v36 }
 0x33d   :  { %v249_v60 = vpop.permute.xlu2 %248 }
 0x33e   :  { %v251_v62 = vmul.f32 %v249_v60, %v243_v61 }
 0x340   :  { %253 = vrot.lane.b32.xlu0 %v251_v62, %s1487_s20 }
 0x3b2   :  { %v254_v0 = vpop.permute.xlu0 %253 }
 0x3b3   :  { %v256_v1 = vadd.f32 %v254_v0, %v246_v63 }
 0x3b5   :  { %1370 = vtanh.f32 %v256_v1 }
 0x3bb   :  { %v1371_v2 = vpop.eup %1370 }
 0x3bc   :  { %259 = vrot.lane.b32.xlu1 %v1371_v2, %s1486_s19 }
 0x42e   :  { %v260_v7 = vpop.permute.xlu1 %259 }
 0x42f   :  { %v1611_v8 = vmul.f32 %v260_v7, %v243_v61 }
 0x431   :  { %v271_v9 = vpack.c.bf16 %v1611_v8, %v1611_v8 }
 0x433   :  { %273 = vrot.lane.b32.xlu2 %v271_v9, %s1487_s20 }
 0x48d   :  { %v274_v11 = vpop.permute.xlu2 %273 }
 0x48e   :  { %1294 = vmatmul.msk.bf16.vlgmr.msra.gmra.mxu3 %vm39_vm1, %v274_v11 }
 0x511   :  { %v287_v14 = vpop.f32.mrf.mxu3 }
 0x512   :  { %v291_v15 = vadd.f32 %v287_v14, %v97_v13  ;;  %v101_v13 = vpop.f32.mrf.mxu0 }
 0x513   :  { %v102_v14 = vadd.f32 %v1585_v10, %v101_v13 }
 0x514   :  { %1372 = vtanh.f32 %v291_v15  ;;  %v1295_v18 = vmul.f32 -1.442695, %v291_v15 }
 0x516   :  { %1374 = vpow2.f32 %v1295_v18 }
 0x519   :  { %v289_v16 = vpop.f32.mrf.mxu3 }
 0x51a   :  { %v1373_v17 = vpop.eup %1372 }
 0x51b   :  { %314 = vrot.lane.b32.xlu0 %v1373_v17, %s1486_s19 }
 0x51c   :  { %v1375_v19 = vpop.eup %1374 }
 0x51d   :  { %v295_v20 = vadd.f32 1.0, %v1375_v19 }
 0x51f   :  { %1376 = vrcp.f32 %v295_v20  ;;  %v307_v26 = vand.u32 2147483648, %v295_v20  ;;  %vm301_vm12 = vweird.f32 %v295_v20  ;;  %v305_v27 = vand.u32 2147483647, %v295_v20 }
 0x521   :  { %v308_v29 = vor.u32 1.1754944e-38, %v307_v26  ;;  %vm306_vm14 = vcmp.eq.f32.partialorder %v305_v27, 8.507059e+37 }
 0x525   :  { %v1377_v21 = vpop.eup %1376 }
 0x526   :  { %v297_v22 = vmul.f32 %v1377_v21, %v295_v20  ;;  %vm302_vm11 = vweird.f32 %v1377_v21 }
 0x527   :  { %vm303_vm13 = vmor %vm301_vm12, %vm302_vm11 }
 0x528   :  { %v298_v23 = vsub.f32 1.0, %v297_v22 }
 0x52a   :  { %v299_v24 = vmul.f32 %v1377_v21, %v298_v23 }
 0x52c   :  { %v300_v25 = vadd.f32 %v1377_v21, %v299_v24 }
 0x52e   :  { %v304_v28 = vsel %vm303_vm13, %v1377_v21, %v300_v25 }
 0x52f   :  { %v309_v31 = vsel %vm306_vm14, %v308_v29, %v304_v28 }
 0x530   :  { %v312_v33 = vmul.f32 %v309_v31, %v256_v1 }
 0x58d   :  { %v315_v30 = vpop.permute.xlu0 %314 }
 0x58e   :  { %v317_v32 = vmul.f32 %v315_v30, %v309_v31 }
 0x590   :  { %319 = vrot.lane.b32.xlu1 %v317_v32, %s1487_s20 }
 0x602   :  { %v320_v34 = vpop.permute.xlu1 %319 }
 0x603   :  { %v322_v35 = vadd.f32 %v320_v34, %v312_v33 }
 0x605   :  { %1378 = vtanh.f32 %v322_v35 }
 0x60b   :  { %v1379_v36 = vpop.eup %1378 }
 0x60c   :  { %325 = vrot.lane.b32.xlu2 %v1379_v36, %s1486_s19 }
 0x666   :  { %v326_v37 = vpop.permute.xlu2 %325 }
 0x667   :  { %v1621_v38 = vmul.f32 %v326_v37, %v309_v31 }
 0x669   :  { %v337_v40 = vpack.c.bf16 %v1621_v38, %v1621_v38 }
 0x66b   :  { %339 = vrot.lane.b32.xlu0 %v337_v40, %s1487_s20 }
 0x6dd   :  { %v340_v41 = vpop.permute.xlu0 %339 }
 0x6de   :  { %1296 = vmatmul.msk.bf16.vlgmr.msrb.gmra.mxu1 %vm39_vm1, %v340_v41 }
 0x75b   :  { %v353_v44 = vpop.f32.mrf.mxu1 }
 0x75c   :  { %v357_v45 = vadd.f32 %v353_v44, %v99_v43  ;;  %v103_v44 = vpop.f32.mrf.mxu0 }
 0x75e   :  { %1380 = vtanh.f32 %v357_v45  ;;  %v1297_v48 = vmul.f32 -1.442695, %v357_v45  ;;  %v104_v45 = vadd.f32 %v1585_v10, %v103_v44 }
 0x760   :  { %1382 = vpow2.f32 %v1297_v48 }
 0x763   :  { %v355_v46 = vpop.f32.mrf.mxu1 }
 0x764   :  { %v1381_v47 = vpop.eup %1380 }
 0x765   :  { %380 = vrot.lane.b32.xlu1 %v1381_v47, %s1486_s19 }
 0x766   :  { %v1383_v49 = vpop.eup %1382 }
 0x767   :  { %v361_v50 = vadd.f32 1.0, %v1383_v49 }
 0x769   :  { %1384 = vrcp.f32 %v361_v50  ;;  %v373_v56 = vand.u32 2147483648, %v361_v50  ;;  %vm367_vm0 = vweird.f32 %v361_v50  ;;  %v371_v57 = vand.u32 2147483647, %v361_v50 }
 0x76b   :  { %v374_v59 = vor.u32 1.1754944e-38, %v373_v56  ;;  %vm372_vm4 = vcmp.eq.f32.partialorder %v371_v57, 8.507059e+37 }
 0x76f   :  { %v1385_v51 = vpop.eup %1384 }
 0x770   :  { %v363_v52 = vmul.f32 %v1385_v51, %v361_v50  ;;  %vm368_vm15 = vweird.f32 %v1385_v51 }
 0x771   :  { %vm369_vm3 = vmor %vm367_vm0, %vm368_vm15 }
 0x772   :  { %v364_v53 = vsub.f32 1.0, %v363_v52 }
 0x774   :  { %v365_v54 = vmul.f32 %v1385_v51, %v364_v53 }
 0x776   :  { %v366_v55 = vadd.f32 %v1385_v51, %v365_v54 }
 0x778   :  { %v370_v58 = vsel %vm369_vm3, %v1385_v51, %v366_v55 }
 0x779   :  { %v375_v61 = vsel %vm372_vm4, %v374_v59, %v370_v58 }
 0x77a   :  { %v378_v63 = vmul.f32 %v375_v61, %v322_v35 }
 0x7d7   :  { %v381_v60 = vpop.permute.xlu1 %380 }
 0x7d8   :  { %v383_v62 = vmul.f32 %v381_v60, %v375_v61 }
 0x7da   :  { %385 = vrot.lane.b32.xlu2 %v383_v62, %s1487_s20 }
 0x834   :  { %v386_v0 = vpop.permute.xlu2 %385 }
 0x835   :  { %v388_v1 = vadd.f32 %v386_v0, %v378_v63 }
 0x837   :  { %1386 = vtanh.f32 %v388_v1 }
 0x83d   :  { %v1387_v2 = vpop.eup %1386 }
 0x83e   :  { %391 = vrot.lane.b32.xlu0 %v1387_v2, %s1486_s19  ;;  %v1344_v2 = vld [vmem:[%s1844_s4] sm:$0xff] }
 0x8b0   :  { %v392_v7 = vpop.permute.xlu0 %391 }
 0x8b1   :  { %v1638_v9 = vmul.f32 %v392_v7, %v375_v61 }
 0x8b3   :  { %v403_v11 = vpack.c.bf16 %v1638_v9, %v1638_v9 }
 0x8b5   :  { %405 = vrot.lane.b32.xlu1 %v403_v11, %s1487_s20 }
 0x927   :  { %v406_v12 = vpop.permute.xlu1 %405 }
 0x928   :  { %1298 = vmatmul.msk.bf16.vlgmr.msrb.gmra.mxu2 %vm39_vm1, %v406_v12 }
 0x9ab   :  { %v419_v15 = vpop.f32.mrf.mxu2 }
 0x9ac   :  { %v423_v16 = vadd.f32 %v419_v15, %v102_v14 }
 0x9ae   :  { %1388 = vtanh.f32 %v423_v16  ;;  %v1299_v19 = vmul.f32 -1.442695, %v423_v16 }
 0x9b0   :  { %1390 = vpow2.f32 %v1299_v19 }
 0x9b3   :  { %v421_v17 = vpop.f32.mrf.mxu2 }
 0x9b4   :  { %v1389_v18 = vpop.eup %1388  ;;  %v54_v17 = vld [vmem:[%s1842_s0 + $0x30] sm:$0xff] }
 0x9b5   :  { %446 = vrot.lane.b32.xlu2 %v1389_v18, %s1486_s19  ;;  %v55_v18 = vld [vmem:[%s1842_s0 + $0x38] sm:$0xff] }
 0x9b6   :  { %v1391_v20 = vpop.eup %1390  ;;  %v59_v19 = vpack.c.bf16 %v55_v18, %v54_v17 }
 0x9b7   :  { %v427_v21 = vadd.f32 1.0, %v1391_v20  ;;  %v1689_v20 = vld [vmem:[%s1846_s5 + $0x8] sm:$0xff] }
 0x9b8   :  { %1281 = vmatmul.msk.bf16.gmra.mxu0 %vm65_vm2, %v59_v19  ;;  %783 = vmatpush.bf16.msrb.mxu1 %v1689_v20 }
 0x9b9   :  { %1392 = vrcp.f32 %v427_v21  ;;  %v439_v27 = vand.u32 2147483648, %v427_v21  ;;  %vm433_vm6 = vweird.f32 %v427_v21  ;;  %v437_v28 = vand.u32 2147483647, %v427_v21  ;;  %846 = vmatpush.bf16.msrb.mxu2 %v1689_v20  ;;  %905 = vmatpush.bf16.msrb.mxu0 %v1689_v20 }
 0x9bb   :  { %v440_v30 = vor.u32 1.1754944e-38, %v439_v27  ;;  %vm438_vm8 = vcmp.eq.f32.partialorder %v437_v28, 8.507059e+37 }
 0x9bf   :  { %v1393_v22 = vpop.eup %1392 }
 0x9c0   :  { %v429_v23 = vmul.f32 %v1393_v22, %v427_v21  ;;  %vm434_vm5 = vweird.f32 %v1393_v22  ;;  %v1695_v21 = vld [vmem:[%s1846_s5] sm:$0xff] }
 0x9c1   :  { %vm435_vm7 = vmor %vm433_vm6, %vm434_vm5  ;;  %784 = vmatpush.bf16.msrb.mxu1 %v1695_v21  ;;  %847 = vmatpush.bf16.msrb.mxu2 %v1695_v21 }
 0x9c2   :  { %v430_v24 = vsub.f32 1.0, %v429_v23  ;;  %906 = vmatpush.bf16.msrb.mxu0 %v1695_v21  ;;  %v757_v23 = vld [vmem:[#allocation2 + $0x8] sm:$0xff] }
 0x9c4   :  { %v431_v25 = vmul.f32 %v1393_v22, %v430_v24  ;;  %v761_v24 = vpack.c.bf16 %v757_v23, %v757_v23 }
 0x9c6   :  { %v432_v26 = vadd.f32 %v1393_v22, %v431_v25  ;;  %1082 = vmatpush.bf16.msra.mxu0 %v1689_v20 }
 0x9c8   :  { %v436_v29 = vsel %vm435_vm7, %v1393_v22, %v432_v26 }
 0x9c9   :  { %v441_v32 = vsel %vm438_vm8, %v440_v30, %v436_v29 }
 0x9ca   :  { %v444_v34 = vmul.f32 %v441_v32, %v388_v1  ;;  %v1345_v1 = vld [vmem:[%s1844_s4 + $0x8] sm:$0xff]  ;;  %1083 = vmatpush.bf16.msra.mxu0 %v1695_v21 }
 0x9cb   :  { %721 = vmatpush.bf16.msra.mxu3 %v1345_v1 }
 0x9cf   :  { %722 = vmatpush.bf16.msra.mxu3 %v1344_v2 }
 0xa0f   :  { %v447_v31 = vpop.permute.xlu2 %446 }
 0xa10   :  { %v449_v33 = vmul.f32 %v447_v31, %v441_v32  ;;  %v1715_v31 = vld [vmem:[%s1845_s6] ss:$0 sm:$0xff] }
 0xa12   :  { %451 = vrot.lane.b32.xlu0 %v449_v33, %s1487_s20 }
 0xa35   :  { %v106_v25 = vpop.f32.mrf.mxu0 }
 0xa36   :  { %v107_v26 = vadd.f32 %v1585_v10, %v106_v25 }
 0xa84   :  { %v452_v35 = vpop.permute.xlu0 %451 }
 0xa85   :  { %v454_v36 = vadd.f32 %v452_v35, %v444_v34  ;;  %v759_v34 = vld [vmem:[#allocation3 + $0x8] sm:$0xff] }
 0xa87   :  { %1394 = vtanh.f32 %v454_v36 }
 0xa8d   :  { %v1395_v37 = vpop.eup %1394 }
 0xa8e   :  { %457 = vrot.lane.b32.xlu1 %v1395_v37, %s1486_s19 }
 0xb00   :  { %v458_v40 = vpop.permute.xlu1 %457 }
 0xb01   :  { %v1648_v41 = vmul.f32 %v458_v40, %v441_v32 }
 0xb03   :  { %v469_v42 = vpack.c.bf16 %v1648_v41, %v1648_v41 }
 0xb05   :  { %471 = vrot.lane.b32.xlu2 %v469_v42, %s1487_s20 }
 0xb5f   :  { %v472_v43 = vpop.permute.xlu2 %471 }
 0xb60   :  { %1300 = vmatmul.msk.bf16.vlgmr.msrb.gmra.mxu3 %vm39_vm1, %v472_v43 }
 0xbe3   :  { %v485_v46 = vpop.f32.mrf.mxu3 }
 0xbe4   :  { %v489_v47 = vadd.f32 %v485_v46, %v104_v45 }
 0xbe6   :  { %1396 = vtanh.f32 %v489_v47  ;;  %v1301_v50 = vmul.f32 -1.442695, %v489_v47 }
 0xbe8   :  { %1398 = vpow2.f32 %v1301_v50 }
 0xbeb   :  { %v487_v48 = vpop.f32.mrf.mxu3 }
 0xbec   :  { %v1397_v49 = vpop.eup %1396 }
 0xbed   :  { %512 = vrot.lane.b32.xlu0 %v1397_v49, %s1486_s19 }
 0xbee   :  { %v1399_v51 = vpop.eup %1398 }
 0xbef   :  { %v493_v52 = vadd.f32 1.0, %v1399_v51 }
 0xbf1   :  { %1400 = vrcp.f32 %v493_v52  ;;  %v505_v58 = vand.u32 2147483648, %v493_v52  ;;  %vm499_vm10 = vweird.f32 %v493_v52  ;;  %v503_v59 = vand.u32 2147483647, %v493_v52 }
 0xbf3   :  { %v506_v61 = vor.u32 1.1754944e-38, %v505_v58  ;;  %vm504_vm12 = vcmp.eq.f32.partialorder %v503_v59, 8.507059e+37 }
 0xbf5   :  { %199 = vrot.lane.b32.xlu0 %v1592_v39, %s1487_s20 }
 0xbf7   :  { %v1401_v53 = vpop.eup %1400 }
 0xbf8   :  { %v495_v54 = vmul.f32 %v1401_v53, %v493_v52  ;;  %vm500_vm9 = vweird.f32 %v1401_v53 }
 0xbf9   :  { %vm501_vm11 = vmor %vm499_vm10, %vm500_vm9 }
 0xbfa   :  { %v496_v55 = vsub.f32 1.0, %v495_v54 }
 0xbfc   :  { %v497_v56 = vmul.f32 %v1401_v53, %v496_v55 }
 0xbfe   :  { %v498_v57 = vadd.f32 %v1401_v53, %v497_v56 }
 0xc00   :  { %v502_v60 = vsel %vm501_vm11, %v1401_v53, %v498_v57 }
 0xc01   :  { %v507_v39 = vsel %vm504_vm12, %v506_v61, %v502_v60 }
 0xc02   :  { %v510_v4 = vmul.f32 %v507_v39, %v454_v36 }
 0xc5f   :  { %v513_v62 = vpop.permute.xlu0 %512 }
 0xc60   :  { %v515_v63 = vmul.f32 %v513_v62, %v507_v39 }
 0xc62   :  { %517 = vrot.lane.b32.xlu1 %v515_v63, %s1487_s20 }
 0xc67   :  { %v200_v0 = vpop.permute.xlu0 %199 }
 0xc68   :  { %202 = vst.msk [vmem:[#allocation4] sm:$0xff] %vm39_vm1, %v200_v0 }
 0xc6a   :  { %264 = vrot.lane.b32.xlu1 %v1611_v8, %s1487_s20 }
 0xc6f   :  { %v671_v8 = vld [vmem:[#allocation4] sm:$0xff] }
 0xcd4   :  { %v518_v5 = vpop.permute.xlu1 %517 }
 0xcd5   :  { %v1668_v6 = vadd.f32 %v518_v5, %v510_v4 }
 0xcd7   :  { %1402 = vtanh.f32 %v1668_v6 }
 0xcdc   :  { %v265_v7 = vpop.permute.xlu1 %264 }
 0xcdd   :  { %v1403_v11 = vpop.eup %1402  ;;  %268 = vst.msk [vmem:[#allocation4 + $0x8] sm:$0xff] %vm39_vm1, %v265_v7 }
 0xcde   :  { %523 = vrot.lane.b32.xlu2 %v1403_v11, %s1486_s19 }
 0xce4   :  { %v672_v12 = vld [vmem:[#allocation4 + $0x8] sm:$0xff] }
 0xce5   :  { %v679_v13 = vpack.c.bf16 %v672_v12, %v671_v8 }
 0xce7   :  { %1314 = vmatmul.msk.bf16.vlgmr.msra.gmra.mxu3 %vm39_vm1, %v679_v13 }
 0xd38   :  { %v524_v14 = vpop.permute.xlu2 %523 }
 0xd39   :  { %v1674_v15 = vmul.f32 %v524_v14, %v507_v39 }
 0xd3b   :  { %v535_v16 = vpack.c.bf16 %v1674_v15, %v1674_v15 }
 0xd3d   :  { %537 = vrot.lane.b32.xlu2 %v535_v16, %s1487_s20 }
 0xd6a   :  { %v724_v32 = vpop.f32.mrf.mxu3 }
 0xd6b   :  { %v725_v33 = vadd.f32 %v1715_v31, %v724_v32 }
 0xd72   :  { %v726_v32 = vpop.f32.mrf.mxu3 }
 0xd97   :  { %v538_v22 = vpop.permute.xlu2 %537 }
 0xd98   :  { %1302 = vmatmul.msk.bf16.vlgmr.msra.gmra.mxu1 %vm39_vm1, %v538_v22 }
 0xd99   :  { %964 = vmatpush.bf16.msra.mxu1 %v1689_v20 }
 0xd9d   :  { %965 = vmatpush.bf16.msra.mxu1 %v1695_v21 }
 0xda8   :  { %1326 = vmatmul.msk.bf16.vlgmr.msrb.gmra.mxu1 %vm39_vm1, %v761_v24 }
 0xda9   :  { %1141 = vmatpush.bf16.msrb.mxu1 %v1689_v20 }
 0xdad   :  { %1142 = vmatpush.bf16.msrb.mxu1 %v1695_v21 }
 0xe15   :  { %v551_v27 = vpop.f32.mrf.mxu1 }
 0xe16   :  { %v555_v28 = vadd.f32 %v551_v27, %v107_v26 }
 0xe18   :  { %1404 = vtanh.f32 %v555_v28  ;;  %v1303_v40 = vmul.f32 -1.442695, %v555_v28 }
 0xe1d   :  { %v553_v29 = vpop.f32.mrf.mxu1 }
 0xe1e   :  { %v1405_v30 = vpop.eup %1404 }
 0xe1f   :  { %578 = vrot.lane.b32.xlu0 %v1405_v30, %s1486_s19 }
 0xe25   :  { %v786_v35 = vpop.f32.mrf.mxu1 }
 0xe26   :  { %v790_v36 = vadd.f32 %v786_v35, %v725_v33  ;;  %v727_v33 = vadd.f32 %v1715_v31, %v726_v32 }
 0xe27   :  { %812 = vrot.lane.b32.xlu0 %v759_v34, %s1487_s20 }
 0xe28   :  { %1406 = vtanh.f32 %v790_v36  ;;  %v1327_v44 = vmul.f32 -1.442695, %v790_v36 }
 0xe29   :  { %1408 = vpow2.f32 %v1303_v40 }
 0xe2d   :  { %v788_v10 = vpop.f32.mrf.mxu1 }
 0xe2e   :  { %v1407_v37 = vpop.eup %1406 }
 0xe2f   :  { %817 = vrot.lane.b32.xlu1 %v1407_v37, %s1486_s19  ;;  %v1409_v42 = vpop.eup %1408 }
 0xe30   :  { %v559_v43 = vadd.f32 1.0, %v1409_v42 }
 0xe32   :  { %1410 = vrcp.f32 %v559_v43  ;;  %v571_v53 = vand.u32 2147483648, %v559_v43  ;;  %vm565_vm13 = vweird.f32 %v559_v43  ;;  %v569_v54 = vand.u32 2147483647, %v559_v43 }
 0xe33   :  { %1412 = vpow2.f32 %v1327_v44 }
 0xe34   :  { %v572_v57 = vor.u32 1.1754944e-38, %v571_v53  ;;  %vm570_vm15 = vcmp.eq.f32.partialorder %v569_v54, 8.507059e+37 }
 0xe38   :  { %v1411_v45 = vpop.eup %1410 }
 0xe39   :  { %v1413_v46 = vpop.eup %1412  ;;  %v561_v47 = vmul.f32 %v1411_v45, %v559_v43  ;;  %vm566_vm2 = vweird.f32 %v1411_v45 }
 0xe3a   :  { %v794_v48 = vadd.f32 1.0, %v1413_v46  ;;  %vm567_vm14 = vmor %vm565_vm13, %vm566_vm2 }
 0xe3b   :  { %v562_v49 = vsub.f32 1.0, %v561_v47 }
 0xe3c   :  { %1414 = vrcp.f32 %v794_v48  ;;  %v806_v63 = vand.u32 2147483648, %v794_v48  ;;  %vm800_vm3 = vweird.f32 %v794_v48  ;;  %v804_v0 = vand.u32 2147483647, %v794_v48 }
 0xe3d   :  { %v563_v50 = vmul.f32 %v1411_v45, %v562_v49 }
 0xe3e   :  { %v807_v2 = vor.u32 1.1754944e-38, %v806_v63  ;;  %vm805_vm5 = vcmp.eq.f32.partialorder %v804_v0, 8.507059e+37  ;;  %v1755_v63 = vpop.f32.mrf.mxu0 }
 0xe3f   :  { %v564_v51 = vadd.f32 %v1411_v45, %v563_v50 }
 0xe41   :  { %v568_v55 = vsel %vm567_vm14, %v1411_v45, %v564_v51 }
 0xe42   :  { %v1415_v52 = vpop.eup %1414  ;;  %v573_v59 = vsel %vm570_vm15, %v572_v57, %v568_v55 }
 0xe43   :  { %v796_v56 = vmul.f32 %v1415_v52, %v794_v48  ;;  %vm801_vm0 = vweird.f32 %v1415_v52  ;;  %v576_v11 = vmul.f32 %v573_v59, %v1668_v6 }
 0xe44   :  { %vm802_vm4 = vmor %vm800_vm3, %vm801_vm0 }
 0xe45   :  { %v797_v61 = vsub.f32 1.0, %v796_v56 }
 0xe47   :  { %v798_v62 = vmul.f32 %v1415_v52, %v797_v61 }
 0xe49   :  { %v799_v39 = vadd.f32 %v1415_v52, %v798_v62 }
 0xe4b   :  { %v803_v1 = vsel %vm802_vm4, %v1415_v52, %v799_v39 }
 0xe4c   :  { %v808_v4 = vsel %vm805_vm5, %v807_v2, %v803_v1 }
 0xe91   :  { %v579_v58 = vpop.permute.xlu0 %578 }
 0xe92   :  { %v581_v60 = vmul.f32 %v579_v58, %v573_v59 }
 0xe94   :  { %583 = vrot.lane.b32.xlu2 %v581_v60, %s1487_s20 }
 0xe99   :  { %v813_v14 = vpop.permute.xlu0 %812 }
 0xe9a   :  { %v815_v16 = vmul.f32 %v813_v14, %v808_v4 }
 0xea1   :  { %v818_v5 = vpop.permute.xlu1 %817 }
 0xea2   :  { %v820_v7 = vmul.f32 %v818_v5, %v808_v4 }
 0xea4   :  { %822 = vrot.lane.b32.xlu1 %v820_v7, %s1487_s20 }
 0xeee   :  { %v584_v8 = vpop.permute.xlu2 %583 }
 0xeef   :  { %v1723_v12 = vadd.f32 %v584_v8, %v576_v11 }
 0xef1   :  { %1416 = vtanh.f32 %v1723_v12 }
 0xef7   :  { %v1417_v13 = vpop.eup %1416 }
 0xef8   :  { %589 = vrot.lane.b32.xlu2 %v1417_v13, %s1486_s19 }
 0xf16   :  { %v823_v17 = vpop.permute.xlu1 %822 }
 0xf17   :  { %v825_v18 = vadd.f32 %v823_v17, %v815_v16 }
 0xf19   :  { %1418 = vtanh.f32 %v825_v18 }
 0xf1f   :  { %v1419_v19 = vpop.eup %1418 }
 0xf20   :  { %828 = vrot.lane.b32.xlu0 %v1419_v19, %s1486_s19 }
 0xf52   :  { %v590_v22 = vpop.permute.xlu2 %589 }
 0xf53   :  { %v1728_v23 = vmul.f32 %v590_v22, %v573_v59 }
 0xf55   :  { %v601_v6 = vpack.c.bf16 %v1728_v23, %v1728_v23 }
 0xf57   :  { %603 = vrot.lane.b32.xlu1 %v601_v6, %s1487_s20 }
 0xf92   :  { %v829_v24 = vpop.permute.xlu0 %828 }
 0xf93   :  { %v831_v25 = vmul.f32 %v829_v24, %v808_v4 }
 0xf95   :  { %v833_v26 = vpack.c.bf16 %v831_v25, %v831_v25 }
 0xf97   :  { %835 = vrot.lane.b32.xlu2 %v833_v26, %s1487_s20 }
 0xfc9   :  { %v604_v27 = vpop.permute.xlu1 %603 }
 0xfca   :  { %1304 = vmatmul.msk.bf16.vlgmr.msra.gmra.mxu2 %vm39_vm1, %v604_v27 }
 0xfcb   :  { %1023 = vmatpush.bf16.msra.mxu2 %v1689_v20 }
 0xfcf   :  { %1024 = vmatpush.bf16.msra.mxu2 %v1695_v21 }
 0xff1   :  { %v836_v28 = vpop.permute.xlu2 %835 }
 0xff2   :  { %1328 = vmatmul.msk.bf16.vlgmr.msrb.gmra.mxu2 %vm39_vm1, %v836_v28 }
 0xff3   :  { %1200 = vmatpush.bf16.msrb.mxu2 %v1689_v20 }
 0xff7   :  { %1201 = vmatpush.bf16.msrb.mxu2 %v1695_v21 }
0x104d   :  { %v1740_v29 = vpop.f32.mrf.mxu2 }
0x1055   :  { %v619_v30 = vpop.f32.mrf.mxu2 }
0x1075   :  { %v849_v34 = vpop.f32.mrf.mxu2 }
0x1076   :  { %v853_v35 = vadd.f32 %v849_v34, %v727_v33 }
0x1078   :  { %1420 = vtanh.f32 %v853_v35  ;;  %v1329_v37 = vmul.f32 -1.442695, %v853_v35 }
0x107a   :  { %1422 = vpow2.f32 %v1329_v37 }
0x107d   :  { %v851_v36 = vpop.f32.mrf.mxu2 }
0x107e   :  { %v1421_v10 = vpop.eup %1420 }
0x107f   :  { %876 = vrot.lane.b32.xlu0 %v1421_v10, %s1486_s19 }
0x1080   :  { %v1423_v20 = vpop.eup %1422 }
0x1081   :  { %v857_v21 = vadd.f32 1.0, %v1423_v20 }
0x1083   :  { %1424 = vrcp.f32 %v857_v21  ;;  %v869_v46 = vand.u32 2147483648, %v857_v21  ;;  %vm863_vm7 = vweird.f32 %v857_v21  ;;  %v867_v47 = vand.u32 2147483647, %v857_v21 }
0x1085   :  { %v870_v49 = vor.u32 1.1754944e-38, %v869_v46  ;;  %vm868_vm9 = vcmp.eq.f32.partialorder %v867_v47, 8.507059e+37 }
0x1087   :  { %330 = vrot.lane.b32.xlu0 %v1621_v38, %s1487_s20 }
0x1089   :  { %v1425_v40 = vpop.eup %1424 }
0x108a   :  { %v859_v42 = vmul.f32 %v1425_v40, %v857_v21  ;;  %vm864_vm6 = vweird.f32 %v1425_v40 }
0x108b   :  { %vm865_vm8 = vmor %vm863_vm7, %vm864_vm6 }
0x108c   :  { %v860_v43 = vsub.f32 1.0, %v859_v42 }
0x108e   :  { %v861_v44 = vmul.f32 %v1425_v40, %v860_v43 }
0x1090   :  { %v862_v45 = vadd.f32 %v1425_v40, %v861_v44 }
0x1092   :  { %v866_v48 = vsel %vm865_vm8, %v1425_v40, %v862_v45 }
0x1093   :  { %v871_v38 = vsel %vm868_vm9, %v870_v49, %v866_v48 }
0x1094   :  { %v874_v53 = vmul.f32 %v871_v38, %v825_v18 }
0x10f1   :  { %v877_v50 = vpop.permute.xlu0 %876 }
0x10f2   :  { %v879_v51 = vmul.f32 %v877_v50, %v871_v38 }
0x10f4   :  { %881 = vrot.lane.b32.xlu1 %v879_v51, %s1487_s20 }
0x10f9   :  { %v331_v52 = vpop.permute.xlu0 %330 }
0x10fa   :  { %334 = vst.msk [vmem:[#allocation4 + $0x10] sm:$0xff] %vm39_vm1, %v331_v52 }
0x10fc   :  { %396 = vrot.lane.b32.xlu1 %v1638_v9, %s1487_s20 }
0x1101   :  { %v673_v58 = vld [vmem:[#allocation4 + $0x10] sm:$0xff] }
0x1166   :  { %v882_v54 = vpop.permute.xlu1 %881 }
0x1167   :  { %v884_v55 = vadd.f32 %v882_v54, %v874_v53 }
0x1169   :  { %1426 = vtanh.f32 %v884_v55 }
0x116e   :  { %v397_v56 = vpop.permute.xlu1 %396 }
0x116f   :  { %v1427_v57 = vpop.eup %1426  ;;  %400 = vst.msk [vmem:[#allocation4 + $0x18] sm:$0xff] %vm39_vm1, %v397_v56 }
0x1170   :  { %887 = vrot.lane.b32.xlu2 %v1427_v57, %s1486_s19 }
0x1176   :  { %v674_v59 = vld [vmem:[#allocation4 + $0x18] sm:$0xff] }
0x1177   :  { %v680_v60 = vpack.c.bf16 %v674_v59, %v673_v58 }
0x1179   :  { %1315 = vmatmul.msk.bf16.gmra.mxu3 %vm39_vm1, %v680_v60 }
0x11ca   :  { %v888_v61 = vpop.permute.xlu2 %887 }
0x11cb   :  { %v890_v62 = vmul.f32 %v888_v61, %v871_v38 }
0x11cd   :  { %v892_v39 = vpack.c.bf16 %v890_v62, %v890_v62 }
0x11cf   :  { %894 = vrot.lane.b32.xlu2 %v892_v39, %s1487_s20 }
0x11fc   :  { %v729_v0 = vpop.f32.mrf.mxu3 }
0x11fd   :  { %v730_v1 = vadd.f32 %v1715_v31, %v729_v0 }
0x1204   :  { %v731_v20 = vpop.f32.mrf.mxu3 }
0x1205   :  { %v732_v21 = vadd.f32 %v1715_v31, %v731_v20 }
0x1229   :  { %v895_v9 = vpop.permute.xlu2 %894 }
0x122a   :  { %1330 = vmatmul.msk.bf16.vlgmr.msrb.gmra.mxu0 %vm39_vm1, %v895_v9 }
0x12a7   :  { %v908_v2 = vpop.f32.mrf.mxu0 }
0x12a8   :  { %v912_v4 = vadd.f32 %v908_v2, %v730_v1 }
0x12aa   :  { %1428 = vtanh.f32 %v912_v4  ;;  %v1331_v11 = vmul.f32 -1.442695, %v912_v4 }
0x12ac   :  { %1430 = vpow2.f32 %v1331_v11 }
0x12af   :  { %v910_v5 = vpop.f32.mrf.mxu0 }
0x12b0   :  { %v1429_v7 = vpop.eup %1428 }
0x12b1   :  { %935 = vrot.lane.b32.xlu0 %v1429_v7, %s1486_s19 }
0x12b2   :  { %v1431_v8 = vpop.eup %1430 }
0x12b3   :  { %v916_v13 = vadd.f32 1.0, %v1431_v8 }
0x12b5   :  { %1432 = vrcp.f32 %v916_v13  ;;  %v928_v22 = vand.u32 2147483648, %v916_v13  ;;  %vm922_vm11 = vweird.f32 %v916_v13  ;;  %v926_v6 = vand.u32 2147483647, %v916_v13 }
0x12b7   :  { %v929_v25 = vor.u32 1.1754944e-38, %v928_v22  ;;  %vm927_vm2 = vcmp.eq.f32.partialorder %v926_v6, 8.507059e+37 }
0x12bb   :  { %v1433_v14 = vpop.eup %1432 }
0x12bc   :  { %v918_v16 = vmul.f32 %v1433_v14, %v916_v13  ;;  %vm923_vm10 = vweird.f32 %v1433_v14 }
0x12bd   :  { %vm924_vm12 = vmor %vm922_vm11, %vm923_vm10 }
0x12be   :  { %v919_v17 = vsub.f32 1.0, %v918_v16 }
0x12c0   :  { %v920_v18 = vmul.f32 %v1433_v14, %v919_v17 }
0x12c2   :  { %v921_v19 = vadd.f32 %v1433_v14, %v920_v18 }
0x12c4   :  { %v925_v24 = vsel %vm924_vm12, %v1433_v14, %v921_v19 }
0x12c5   :  { %v930_v27 = vsel %vm927_vm2, %v929_v25, %v925_v24 }
0x12c6   :  { %v933_v30 = vmul.f32 %v930_v27, %v884_v55 }
0x1323   :  { %v936_v26 = vpop.permute.xlu0 %935 }
0x1324   :  { %v938_v28 = vmul.f32 %v936_v26, %v930_v27 }
0x1326   :  { %940 = vrot.lane.b32.xlu1 %v938_v28, %s1487_s20 }
0x1398   :  { %v941_v32 = vpop.permute.xlu1 %940 }
0x1399   :  { %v943_v33 = vadd.f32 %v941_v32, %v933_v30  ;;  %v1484_v32 = vld [vmem:[%s1843_s3] ss:$0 sm:$0xff]  ;;  %s1488_s3 = smov 96  }
0x139b   :  { %1434 = vtanh.f32 %v943_v33 }
0x13a1   :  { %v1435_v34 = vpop.eup %1434 }
0x13a2   :  { %946 = vrot.lane.b32.xlu2 %v1435_v34, %s1486_s19 }
0x13fc   :  { %v947_v35 = vpop.permute.xlu2 %946 }
0x13fd   :  { %v949_v36 = vmul.f32 %v947_v35, %v930_v27 }
0x13ff   :  { %v951_v10 = vpack.c.bf16 %v949_v36, %v949_v36 }
0x1401   :  { %953 = vrot.lane.b32.xlu0 %v951_v10, %s1487_s20 }
0x1473   :  { %v954_v37 = vpop.permute.xlu0 %953 }
0x1474   :  { %1332 = vmatmul.msk.bf16.vlgmr.msra.gmra.mxu1 %vm39_vm1, %v954_v37 }
0x14f1   :  { %v967_v40 = vpop.f32.mrf.mxu1 }
0x14f2   :  { %v971_v42 = vadd.f32 %v967_v40, %v732_v21 }
0x14f4   :  { %1436 = vtanh.f32 %v971_v42  ;;  %v1333_v45 = vmul.f32 -1.442695, %v971_v42 }
0x14f6   :  { %1438 = vpow2.f32 %v1333_v45 }
0x14f9   :  { %v969_v43 = vpop.f32.mrf.mxu1 }
0x14fa   :  { %v1437_v44 = vpop.eup %1436 }
0x14fb   :  { %994 = vrot.lane.b32.xlu1 %v1437_v44, %s1486_s19 }
0x14fc   :  { %v1439_v46 = vpop.eup %1438 }
0x14fd   :  { %v975_v47 = vadd.f32 1.0, %v1439_v46 }
0x14ff   :  { %1440 = vrcp.f32 %v975_v47  ;;  %v987_v52 = vand.u32 2147483648, %v975_v47  ;;  %vm981_vm14 = vweird.f32 %v975_v47  ;;  %v985_v53 = vand.u32 2147483647, %v975_v47 }
0x1501   :  { %v988_v55 = vor.u32 1.1754944e-38, %v987_v52  ;;  %vm986_vm0 = vcmp.eq.f32.partialorder %v985_v53, 8.507059e+37 }
0x1503   :  { %462 = vrot.lane.b32.xlu1 %v1648_v41, %s1487_s20 }
0x1505   :  { %v1441_v48 = vpop.eup %1440 }
0x1506   :  { %v977_v49 = vmul.f32 %v1441_v48, %v975_v47  ;;  %vm982_vm13 = vweird.f32 %v1441_v48 }
0x1507   :  { %vm983_vm15 = vmor %vm981_vm14, %vm982_vm13 }
0x1508   :  { %v978_v50 = vsub.f32 1.0, %v977_v49 }
0x150a   :  { %v979_v38 = vmul.f32 %v1441_v48, %v978_v50 }
0x150c   :  { %v980_v51 = vadd.f32 %v1441_v48, %v979_v38 }
0x150e   :  { %v984_v54 = vsel %vm983_vm15, %v1441_v48, %v980_v51 }
0x150f   :  { %v989_v41 = vsel %vm986_vm0, %v988_v55, %v984_v54 }
0x1510   :  { %v992_v59 = vmul.f32 %v989_v41, %v943_v33  ;;  %v109_v33 = vadd.f32 %v1484_v32, %v1755_v63 }
0x1512   :  { %v621_v35 = vadd.f32 %v1740_v29, %v109_v33 }
0x1514   :  { %v1305_v43 = vmul.f32 -1.442695, %v621_v35 }
0x156d   :  { %v995_v56 = vpop.permute.xlu1 %994 }
0x156e   :  { %v997_v57 = vmul.f32 %v995_v56, %v989_v41 }
0x1570   :  { %999 = vrot.lane.b32.xlu2 %v997_v57, %s1487_s20 }
0x1575   :  { %v463_v58 = vpop.permute.xlu1 %462 }
0x1576   :  { %466 = vst.msk [vmem:[#allocation4 + $0x20] sm:$0xff] %vm39_vm1, %v463_v58 }
0x1578   :  { %528 = vrot.lane.b32.xlu2 %v1674_v15, %s1487_s20 }
0x157d   :  { %v675_v9 = vld [vmem:[#allocation4 + $0x20] sm:$0xff] }
0x15ca   :  { %v1000_v60 = vpop.permute.xlu2 %999 }
0x15cb   :  { %v1002_v61 = vadd.f32 %v1000_v60, %v992_v59 }
0x15cd   :  { %1442 = vtanh.f32 %v1002_v61 }
0x15d2   :  { %v529_v62 = vpop.permute.xlu2 %528 }
0x15d3   :  { %v1443_v39 = vpop.eup %1442  ;;  %532 = vst.msk [vmem:[#allocation4 + $0x28] sm:$0xff] %vm39_vm1, %v529_v62 }
0x15d4   :  { %1005 = vrot.lane.b32.xlu0 %v1443_v39, %s1486_s19 }
0x15da   :  { %v676_v0 = vld [vmem:[#allocation4 + $0x28] sm:$0xff] }
0x15db   :  { %v681_v1 = vpack.c.bf16 %v676_v0, %v675_v9 }
0x15dd   :  { %1316 = vmatmul.msk.bf16.gmra.mxu3 %vm39_vm1, %v681_v1 }
0x1646   :  { %v1006_v2 = vpop.permute.xlu0 %1005 }
0x1647   :  { %v1008_v4 = vmul.f32 %v1006_v2, %v989_v41 }
0x1649   :  { %v1010_v5 = vpack.c.bf16 %v1008_v4, %v1008_v4 }
0x164b   :  { %1012 = vrot.lane.b32.xlu0 %v1010_v5, %s1487_s20 }
0x1660   :  { %v734_v7 = vpop.f32.mrf.mxu3 }
0x1661   :  { %v735_v11 = vadd.f32 %v1715_v31, %v734_v7 }
0x1668   :  { %v736_v59 = vpop.f32.mrf.mxu3 }
0x1669   :  { %v737_v60 = vadd.f32 %v1715_v31, %v736_v59 }
0x16bd   :  { %v1013_v15 = vpop.permute.xlu0 %1012 }
0x16be   :  { %1334 = vmatmul.msk.bf16.vlgmr.msra.gmra.mxu2 %vm39_vm1, %v1013_v15 }
0x1741   :  { %v1026_v8 = vpop.f32.mrf.mxu2 }
0x1742   :  { %v1030_v13 = vadd.f32 %v1026_v8, %v735_v11 }
0x1744   :  { %1444 = vtanh.f32 %v1030_v13  ;;  %v1335_v17 = vmul.f32 -1.442695, %v1030_v13 }
0x1746   :  { %1446 = vpow2.f32 %v1335_v17 }
0x1749   :  { %v1028_v14 = vpop.f32.mrf.mxu2 }
0x174a   :  { %v1445_v16 = vpop.eup %1444 }
0x174b   :  { %1053 = vrot.lane.b32.xlu1 %v1445_v16, %s1486_s19 }
0x174c   :  { %v1447_v18 = vpop.eup %1446 }
0x174d   :  { %v1034_v19 = vadd.f32 1.0, %v1447_v18 }
0x174f   :  { %1448 = vrcp.f32 %v1034_v19  ;;  %v1046_v27 = vand.u32 2147483648, %v1034_v19  ;;  %vm1040_vm4 = vweird.f32 %v1034_v19  ;;  %v1044_v28 = vand.u32 2147483647, %v1034_v19 }
0x1750   :  { %1450 = vtanh.f32 %v621_v35 }
0x1751   :  { %v1047_v34 = vor.u32 1.1754944e-38, %v1046_v27  ;;  %vm1045_vm6 = vcmp.eq.f32.partialorder %v1044_v28, 8.507059e+37 }
0x1755   :  { %v1449_v22 = vpop.eup %1448 }
0x1756   :  { %v1036_v6 = vmul.f32 %v1449_v22, %v1034_v19  ;;  %vm1041_vm3 = vweird.f32 %v1449_v22  ;;  %v1451_v20 = vpop.eup %1450 }
0x1757   :  { %vm1042_vm5 = vmor %vm1040_vm4, %vm1041_vm3 }
0x1758   :  { %v1037_v24 = vsub.f32 1.0, %v1036_v6 }
0x175a   :  { %v1038_v25 = vmul.f32 %v1449_v22, %v1037_v24 }
0x175c   :  { %v1039_v26 = vadd.f32 %v1449_v22, %v1038_v25 }
0x175e   :  { %v1043_v30 = vsel %vm1042_vm5, %v1449_v22, %v1039_v26 }
0x175f   :  { %v1048_v10 = vsel %vm1045_vm6, %v1047_v34, %v1043_v30 }
0x1760   :  { %v1051_v21 = vmul.f32 %v1048_v10, %v1002_v61 }
0x17bd   :  { %v1054_v36 = vpop.permute.xlu1 %1053 }
0x17be   :  { %v1056_v37 = vmul.f32 %v1054_v36, %v1048_v10 }
0x17c0   :  { %1058 = vrot.lane.b32.xlu2 %v1056_v37, %s1487_s20 }
0x17c8   :  { %644 = vrot.lane.b32.xlu2 %v1451_v20, %s1486_s19 }
0x181a   :  { %v1059_v40 = vpop.permute.xlu2 %1058 }
0x181b   :  { %v1785_v42 = vadd.f32 %v1059_v40, %v1051_v21 }
0x181d   :  { %1452 = vtanh.f32 %v1785_v42 }
0x181e   :  { %1454 = vpow2.f32 %v1305_v43 }
0x1822   :  { %v645_v56 = vpop.permute.xlu2 %644 }
0x1823   :  { %v1453_v63 = vpop.eup %1452 }
0x1824   :  { %1064 = vrot.lane.b32.xlu0 %v1453_v63, %s1486_s19  ;;  %v1455_v29 = vpop.eup %1454 }
0x1825   :  { %v625_v44 = vadd.f32 1.0, %v1455_v29 }
0x1827   :  { %1456 = vrcp.f32 %v625_v44  ;;  %v637_v52 = vand.u32 2147483648, %v625_v44  ;;  %vm631_vm8 = vweird.f32 %v625_v44  ;;  %v635_v53 = vand.u32 2147483647, %v625_v44 }
0x1829   :  { %v638_v55 = vor.u32 1.1754944e-38, %v637_v52  ;;  %vm636_vm10 = vcmp.eq.f32.partialorder %v635_v53, 8.507059e+37 }
0x182d   :  { %v1457_v45 = vpop.eup %1456 }
0x182e   :  { %v627_v46 = vmul.f32 %v1457_v45, %v625_v44  ;;  %vm632_vm7 = vweird.f32 %v1457_v45 }
0x182f   :  { %vm633_vm9 = vmor %vm631_vm8, %vm632_vm7  ;;  %vm44_vm8 = vcmask 7168  }
0x1830   :  { %v628_v47 = vsub.f32 1.0, %v627_v46  ;;  %45 = vst.msk [vmem:[%s1849_s9] sm:$0xff] %vm44_vm8, %v1485_v3 }
0x1832   :  { %v629_v48 = vmul.f32 %v1457_v45, %v628_v47 }
0x1834   :  { %v630_v38 = vadd.f32 %v1457_v45, %v629_v48 }
0x1836   :  { %v634_v54 = vsel %vm633_vm9, %v1457_v45, %v630_v38 }
0x1837   :  { %v639_v41 = vsel %vm636_vm10, %v638_v55, %v634_v54 }
0x1838   :  { %v647_v57 = vmul.f32 %v645_v56, %v639_v41  ;;  %v642_v9 = vmul.f32 %v639_v41, %v1723_v12 }
0x1896   :  { %v1065_v49 = vpop.permute.xlu0 %1064 }
0x1897   :  { %v1067_v50 = vmul.f32 %v1065_v49, %v1048_v10 }
0x1899   :  { %v1069_v51 = vpack.c.bf16 %v1067_v50, %v1067_v50 }
0x189b   :  { %1071 = vrot.lane.b32.xlu1 %v1069_v51, %s1487_s20 }
0x18a3   :  { %649 = vrot.lane.b32.xlu1 %v647_v57, %s1487_s20 }
0x190d   :  { %v1072_v58 = vpop.permute.xlu1 %1071 }
0x190e   :  { %1336 = vmatmul.msk.bf16.vlgmr.msra.gmra.mxu0 %vm39_vm1, %v1072_v58 }
0x1915   :  { %v650_v39 = vpop.permute.xlu1 %649 }
0x1916   :  { %v1794_v0 = vadd.f32 %v650_v39, %v642_v9 }
0x198b   :  { %v1085_v61 = vpop.f32.mrf.mxu0 }
0x198c   :  { %v1089_v62 = vadd.f32 %v1085_v61, %v737_v60 }
0x198e   :  { %1458 = vtanh.f32 %v1089_v62  ;;  %v1337_v5 = vmul.f32 -1.442695, %v1089_v62 }
0x198f   :  { %1460 = vtanh.f32 %v1794_v0 }
0x1990   :  { %1462 = vpow2.f32 %v1337_v5 }
0x1993   :  { %v1087_v1 = vpop.f32.mrf.mxu0 }
0x1994   :  { %v1459_v2 = vpop.eup %1458 }
0x1995   :  { %1112 = vrot.lane.b32.xlu0 %v1459_v2, %s1486_s19  ;;  %v1461_v4 = vpop.eup %1460 }
0x1996   :  { %v1463_v15 = vpop.eup %1462 }
0x1997   :  { %v1093_v7 = vadd.f32 1.0, %v1463_v15 }
0x1999   :  { %1464 = vrcp.f32 %v1093_v7  ;;  %v1105_v16 = vand.u32 2147483648, %v1093_v7  ;;  %vm1099_vm12 = vweird.f32 %v1093_v7  ;;  %v1103_v17 = vand.u32 2147483647, %v1093_v7 }
0x199b   :  { %v1106_v19 = vor.u32 1.1754944e-38, %v1105_v16  ;;  %vm1104_vm13 = vcmp.eq.f32.partialorder %v1103_v17, 8.507059e+37 }
0x199d   :  { %655 = vrot.lane.b32.xlu0 %v1461_v4, %s1486_s19 }
0x199f   :  { %v1465_v11 = vpop.eup %1464 }
0x19a0   :  { %v1095_v8 = vmul.f32 %v1465_v11, %v1093_v7  ;;  %vm1100_vm11 = vweird.f32 %v1465_v11 }
0x19a1   :  { %vm1101_vm2 = vmor %vm1099_vm12, %vm1100_vm11 }
0x19a2   :  { %v1096_v13 = vsub.f32 1.0, %v1095_v8 }
0x19a4   :  { %v1097_v12 = vmul.f32 %v1465_v11, %v1096_v13 }
0x19a6   :  { %v1098_v14 = vadd.f32 %v1465_v11, %v1097_v12 }
0x19a8   :  { %v1102_v18 = vsel %vm1101_vm2, %v1465_v11, %v1098_v14 }
0x19a9   :  { %v1107_v6 = vsel %vm1104_vm13, %v1106_v19, %v1102_v18 }
0x19aa   :  { %v1110_v27 = vmul.f32 %v1107_v6, %v1785_v42 }
0x1a07   :  { %v1113_v22 = vpop.permute.xlu0 %1112 }
0x1a08   :  { %v1115_v24 = vmul.f32 %v1113_v22, %v1107_v6 }
0x1a0a   :  { %1117 = vrot.lane.b32.xlu2 %v1115_v24, %s1487_s20 }
0x1a0f   :  { %v656_v25 = vpop.permute.xlu0 %655 }
0x1a10   :  { %v658_v26 = vmul.f32 %v656_v25, %v639_v41 }
0x1a12   :  { %594 = vrot.lane.b32.xlu2 %v1728_v23, %s1487_s20  ;;  %660 = vrot.lane.b32.xlu0 %v658_v26, %s1487_s20 }
0x1a64   :  { %v1118_v28 = vpop.permute.xlu2 %1117 }
0x1a65   :  { %v1120_v30 = vadd.f32 %v1118_v28, %v1110_v27 }
0x1a67   :  { %1466 = vtanh.f32 %v1120_v30 }
0x1a6c   :  { %v595_v32 = vpop.permute.xlu2 %594 }
0x1a6d   :  { %v1467_v33 = vpop.eup %1466  ;;  %598 = vst.msk [vmem:[#allocation4 + $0x30] sm:$0xff] %vm39_vm1, %v595_v32 }
0x1a6e   :  { %1123 = vrot.lane.b32.xlu1 %v1467_v33, %s1486_s19 }
0x1a74   :  { %v677_v35 = vld [vmem:[#allocation4 + $0x30] sm:$0xff] }
0x1a84   :  { %v661_v34 = vpop.permute.xlu0 %660 }
0x1a85   :  { %664 = vst.msk [vmem:[#allocation4 + $0x38] sm:$0xff] %vm39_vm1, %v661_v34 }
0x1a86   :  { %665 = vst.msk [vmem:[#allocation2] sm:$0xff] %vm39_vm1, %v661_v34 }
0x1a8c   :  { %v678_v23 = vld [vmem:[#allocation4 + $0x38] sm:$0xff] }
0x1a8d   :  { %v682_v36 = vpack.c.bf16 %v678_v23, %v677_v35 }
0x1a8f   :  { %1317 = vmatmul.msk.bf16.gmra.mxu3 %vm39_vm1, %v682_v36  ;;  %v14_v36 = vstv %s1848_s8 }
0x1a90   :  { %15 = vst [vmem:[#allocation6] sm:$0x1] %v14_v36 }
0x1ae0   :  { %v1124_v10 = vpop.permute.xlu1 %1123 }
0x1ae1   :  { %v1126_v37 = vmul.f32 %v1124_v10, %v1107_v6  ;;  %v1354_v10 = vld [vmem:[%s1847_s7] ss:$0 sm:$0xff] }
0x1ae3   :  { %v1128_v20 = vpack.c.bf16 %v1126_v37, %v1126_v37 }
0x1ae5   :  { %1130 = vrot.lane.b32.xlu1 %v1128_v20, %s1487_s20 }
0x1b12   :  { %v739_v40 = vpop.f32.mrf.mxu3 }
0x1b13   :  { %v740_v42 = vadd.f32 %v1715_v31, %v739_v40 }
0x1b1a   :  { %v741_v2 = vpop.f32.mrf.mxu3 }
0x1b1b   :  { %v742_v4 = vadd.f32 %v1715_v31, %v741_v2 }
0x1b57   :  { %v1131_v21 = vpop.permute.xlu1 %1130 }
0x1b58   :  { %1338 = vmatmul.msk.bf16.vlgmr.msrb.gmra.mxu1 %vm39_vm1, %v1131_v21 }
0x1bd5   :  { %v1144_v63 = vpop.f32.mrf.mxu1 }
0x1bd6   :  { %v1148_v43 = vadd.f32 %v1144_v63, %v740_v42  ;;  %v1355_v42 = vld [vmem:[#allocation6] ss:$0 sm:$0xff] }
0x1bd8   :  { %1468 = vtanh.f32 %v1148_v43  ;;  %v1339_v45 = vmul.f32 -1.442695, %v1148_v43 }
0x1bda   :  { %1470 = vpow2.f32 %v1339_v45 }
0x1bdd   :  { %v1146_v29 = vpop.f32.mrf.mxu1 }
0x1bde   :  { %v1469_v44 = vpop.eup %1468 }
0x1bdf   :  { %1171 = vrot.lane.b32.xlu2 %v1469_v44, %s1486_s19 }
0x1be0   :  { %v1471_v46 = vpop.eup %1470 }
0x1be1   :  { %v1152_v47 = vadd.f32 1.0, %v1471_v46 }
0x1be3   :  { %1472 = vrcp.f32 %v1152_v47  ;;  %v1164_v52 = vand.u32 2147483648, %v1152_v47  ;;  %vm1158_vm15 = vweird.f32 %v1152_v47  ;;  %v1162_v53 = vand.u32 2147483647, %v1152_v47 }
0x1be5   :  { %v1165_v55 = vor.u32 1.1754944e-38, %v1164_v52  ;;  %vm1163_vm3 = vcmp.eq.f32.partialorder %v1162_v53, 8.507059e+37 }
0x1be9   :  { %v1473_v48 = vpop.eup %1472 }
0x1bea   :  { %v1154_v49 = vmul.f32 %v1473_v48, %v1152_v47  ;;  %vm1159_vm14 = vweird.f32 %v1473_v48 }
0x1beb   :  { %vm1160_vm0 = vmor %vm1158_vm15, %vm1159_vm14 }
0x1bec   :  { %v1155_v50 = vsub.f32 1.0, %v1154_v49 }
0x1bee   :  { %v1156_v38 = vmul.f32 %v1473_v48, %v1155_v50 }
0x1bf0   :  { %v1157_v51 = vadd.f32 %v1473_v48, %v1156_v38 }
0x1bf2   :  { %v1161_v54 = vsel %vm1160_vm0, %v1473_v48, %v1157_v51 }
0x1bf3   :  { %v1166_v41 = vsel %vm1163_vm3, %v1165_v55, %v1161_v54 }
0x1bf4   :  { %v1169_v58 = vmul.f32 %v1166_v41, %v1120_v30 }
0x1c39   :  { %v1172_v56 = vpop.permute.xlu2 %1171 }
0x1c3a   :  { %v1174_v57 = vmul.f32 %v1172_v56, %v1166_v41 }
0x1c3c   :  { %1176 = vrot.lane.b32.xlu0 %v1174_v57, %s1487_s20 }
0x1cae   :  { %v1177_v59 = vpop.permute.xlu0 %1176 }
0x1caf   :  { %v1179_v60 = vadd.f32 %v1177_v59, %v1169_v58 }
0x1cb1   :  { %1474 = vtanh.f32 %v1179_v60 }
0x1cb7   :  { %v1475_v61 = vpop.eup %1474 }
0x1cb8   :  { %1182 = vrot.lane.b32.xlu1 %v1475_v61, %s1486_s19 }
0x1d2a   :  { %v1183_v62 = vpop.permute.xlu1 %1182 }
0x1d2b   :  { %v1185_v39 = vmul.f32 %v1183_v62, %v1166_v41 }
0x1d2d   :  { %v1187_v9 = vpack.c.bf16 %v1185_v39, %v1185_v39 }
0x1d2f   :  { %1189 = vrot.lane.b32.xlu2 %v1187_v9, %s1487_s20 }
0x1d89   :  { %v1190_v1 = vpop.permute.xlu2 %1189 }
0x1d8a   :  { %1340 = vmatmul.msk.bf16.vlgmr.msrb.gmra.mxu2 %vm39_vm1, %v1190_v1 }
0x1e0d   :  { %v1203_v5 = vpop.f32.mrf.mxu2 }
0x1e0e   :  { %v1207_v15 = vadd.f32 %v1203_v5, %v742_v4 }
0x1e10   :  { %1476 = vtanh.f32 %v1207_v15  ;;  %v1341_v8 = vmul.f32 -1.442695, %v1207_v15 }
0x1e12   :  { %1478 = vpow2.f32 %v1341_v8 }
0x1e15   :  { %v1205_v7 = vpop.f32.mrf.mxu2 }
0x1e16   :  { %v1477_v11 = vpop.eup %1476 }
0x1e17   :  { %1230 = vrot.lane.b32.xlu0 %v1477_v11, %s1486_s19 }
0x1e18   :  { %v1479_v13 = vpop.eup %1478 }
0x1e19   :  { %v1211_v12 = vadd.f32 1.0, %v1479_v13 }
0x1e1b   :  { %1480 = vrcp.f32 %v1211_v12  ;;  %v1223_v22 = vand.u32 2147483648, %v1211_v12  ;;  %vm1217_vm5 = vweird.f32 %v1211_v12  ;;  %v1221_v31 = vand.u32 2147483647, %v1211_v12 }
0x1e1d   :  { %v1224_v24 = vor.u32 1.1754944e-38, %v1223_v22  ;;  %vm1222_vm7 = vcmp.eq.f32.partialorder %v1221_v31, 8.507059e+37 }
0x1e21   :  { %v1481_v14 = vpop.eup %1480 }
0x1e22   :  { %v1213_v16 = vmul.f32 %v1481_v14, %v1211_v12  ;;  %vm1218_vm4 = vweird.f32 %v1481_v14 }
0x1e23   :  { %vm1219_vm6 = vmor %vm1217_vm5, %vm1218_vm4 }
0x1e24   :  { %v1214_v17 = vsub.f32 1.0, %v1213_v16 }
0x1e26   :  { %v1215_v18 = vmul.f32 %v1481_v14, %v1214_v17 }
0x1e28   :  { %v1216_v19 = vadd.f32 %v1481_v14, %v1215_v18 }
0x1e2a   :  { %v1220_v6 = vsel %vm1219_vm6, %v1481_v14, %v1216_v19 }
0x1e2b   :  { %v1225_v26 = vsel %vm1222_vm7, %v1224_v24, %v1220_v6 }
0x1e2c   :  { %v1228_v28 = vmul.f32 %v1225_v26, %v1179_v60 }
0x1e89   :  { %v1231_v25 = vpop.permute.xlu0 %1230 }
0x1e8a   :  { %v1233_v27 = vmul.f32 %v1231_v25, %v1225_v26 }
0x1e8c   :  { %1235 = vrot.lane.b32.xlu1 %v1233_v27, %s1487_s20 }
0x1efe   :  { %v1236_v30 = vpop.permute.xlu1 %1235 }
0x1eff   :  { %v1238_v32 = vadd.f32 %v1236_v30, %v1228_v28 }
0x1f01   :  { %1482 = vtanh.f32 %v1238_v32 }
0x1f07   :  { %v1483_v33 = vpop.eup %1482 }
0x1f08   :  { %1241 = vrot.lane.b32.xlu2 %v1483_v33, %s1486_s19 }
0x1f10   :  { %667 = vrot.lane.b32.xlu2 %v1794_v0, %s1488_s3 }
0x1f62   :  { %v1242_v34 = vpop.permute.xlu2 %1241 }
0x1f63   :  { %v1244_v35 = vmul.f32 %v1242_v34, %v1225_v26 }
0x1f65   :  { %1246 = vrot.lane.b32.xlu0 %v1244_v35, %s1487_s20 }
0x1f6a   :  { %v668_v23 = vpop.permute.xlu2 %667 }
0x1f6b   :  { %670 = vst.msk [vmem:[#allocation3] sm:$0xff] %vm39_vm1, %v668_v23 }
0x1f6d   :  { %1251 = vrot.lane.b32.xlu0 %v1238_v32, %s1488_s3 }
0x1fd7   :  { %v1247_v0 = vpop.permute.xlu0 %1246 }
0x1fd8   :  { %1249 = vst.msk [vmem:[#allocation2 + $0x8] sm:$0xff] %vm39_vm1, %v1247_v0 }
0x1fdf   :  { %v1252_v37 = vpop.permute.xlu0 %1251  ;;  %v1258_v20 = vld [vmem:[#allocation2 + $0x8] sm:$0xff] }
0x1fe0   :  { %1254 = vst.msk [vmem:[#allocation3 + $0x8] sm:$0xff] %vm39_vm1, %v1252_v37  ;;  %v1263_v21 = vmul.f32 %v1354_v10, %v1258_v20 }
0x1fe2   :  { %v1264_v40 = vsel %vm39_vm1, %v1263_v21, 0.0 }
0x1fe3   :  { %1265 = vadd.xlane.f32.xlu1 %v1264_v40 }
0x2056   :  { %v1266_v63 = vpop.xlane.xlu1 %1265 }
0x2057   :  { %v1271_v43 = vadd.f32 %v1355_v42, %v1266_v63 }
0x2059   :  { %1273 = vst.msk [vmem:[%s1849_s9] sm:$0xff] %vm44_vm8, %v1271_v43 }

</bundles_post_ra>
